<compile_context>
chip_gen: v7x
topology: tpu7x:2x2x1
jax: 0.10.0
libtpu: 0.0.40
codegen_flags: <defaults>
</compile_context>

<pallas_src>
import functools

import jax
import jax.numpy as jnp
from jax import lax
from jax.experimental import pallas as pl
from jax.experimental.pallas import tpu as pltpu


def _recurrent_block_kernel(x_ref, w_ref, scale1_ref, scale2_ref, shift_ref,
                            o_ref, xp_ref, *, TR, NR, H, W, C):
    """Fused (3x3 conv + BN + ReLU) x 2 for one TR-row tile of one image.

    x_ref:      (H, W, C)     full NHWC image (batch dim squeezed; this block is
                              resident across the row-tile grid axis)
    w_ref:      (9*C, C)      conv weights, row index = (dy*3 + dx)*C + c_in
    scale1_ref: (1, C) f32    folded BN scale, stage 1  (= gamma/sqrt(var+eps))
    scale2_ref: (1, C) f32    stage-2 scale with the (x1 + x1) doubling folded in
    shift_ref:  (1, C) f32    folded shift (= (bias - mean)*scale + beta)
    o_ref:      (TR, W, C)    output row tile
    xp_ref:     VMEM (TR+4, W+2, C)  zero-bordered padded buffer shared by both
                stages: stage 1 reads rows [0, TR+4) (input rows row0-2..row0+TR+1,
                out-of-image rows = 0); stage 2 reuses rows [0, TR+2) holding x1
                rows row0-1..row0+TR (out-of-image rows = 0).
    """
    j = pl.program_id(1)
    row0 = pl.multiple_of(j * TR, TR)      # first output row of this tile

    # ---- Border-only zeroing (the interior is fully overwritten below). ----
    xp_ref[:, 0:1, :] = jnp.zeros((TR + 4, 1, C), xp_ref.dtype)            # left pad
    xp_ref[:, W + 1:W + 2, :] = jnp.zeros((TR + 4, 1, C), xp_ref.dtype)    # right pad
    xp_ref[0:2, :, :] = jnp.zeros((2, W + 2, C), xp_ref.dtype)             # top halo
    xp_ref[TR + 2:TR + 4, :, :] = jnp.zeros((2, W + 2, C), xp_ref.dtype)   # bottom halo

    # ---- Stage-1 padded input: rows row0-2 .. row0+TR+1 (zeros outside). ----
    # Central TR rows are always inside the image.
    xp_ref[2:TR + 2, 1:W + 1, :] = x_ref[pl.ds(row0, TR), :, :].astype(xp_ref.dtype)

    @pl.when(j > 0)
    def _():  # top 2 halo rows exist in the image
        xp_ref[0:2, 1:W + 1, :] = (
            x_ref[pl.ds(row0 - 2, 2), :, :].astype(xp_ref.dtype))

    @pl.when(j < NR - 1)
    def _():  # bottom 2 halo rows exist in the image
        xp_ref[TR + 2:TR + 4, 1:W + 1, :] = (
            x_ref[pl.ds(row0 + TR, 2), :, :].astype(xp_ref.dtype))

    shift = shift_ref[...]                 # (1, C) f32

    def conv_bn_relu(nrows, scale):
        # Register im2col: 9 static ref-slice views concatenated on the lane
        # axis -> a single (nrows*W, 9C) operand for one MXU matmul (K = 9C).
        pieces = []
        for dy in range(3):
            for dx in range(3):
                p = xp_ref[dy:dy + nrows, dx:dx + W, :]        # (nrows, W, C)
                pieces.append(p.reshape(nrows * W, C))
        col = jnp.concatenate(pieces, axis=-1)                 # (nrows*W, 9C)
        acc = jnp.dot(col, w_ref[...],
                      preferred_element_type=jnp.float32)      # f32 accumulation
        return jnp.maximum(acc * scale + shift, 0.0)           # f32 epilogue

    # ---- Stage 1: x1 rows row0-1 .. row0+TR (TR+2 rows incl. 1-row halo). ----
    y1 = conv_bn_relu(TR + 2, scale1_ref[...])
    xp_ref[0:TR + 2, 1:W + 1, :] = y1.reshape(TR + 2, W, C).astype(xp_ref.dtype)

    # x1 rows that fall outside the image must act as zero padding for stage 2.
    @pl.when(j == 0)
    def _():
        xp_ref[0:1, 1:W + 1, :] = jnp.zeros((1, W, C), xp_ref.dtype)

    @pl.when(j == NR - 1)
    def _():
        xp_ref[TR + 1:TR + 2, 1:W + 1, :] = jnp.zeros((1, W, C), xp_ref.dtype)

    # ---- Stage 2: out = conv_bn_relu(x1 + x1); the 2x is folded into scale2. ----
    y2 = conv_bn_relu(TR, scale2_ref[...])
    o_ref[...] = y2.reshape(TR, W, C).astype(o_ref.dtype)


def recurrent_block_forward(x_nchw, params, t=2, row_block=32,
                            compute_dtype=jnp.bfloat16):
    """Pallas equivalent of Recurrent_block.forward (inference-mode BN).

    For any t >= 1 the given PyTorch loop reduces to conv(2 * conv(x)); both
    stages are fused in a single kernel, so the intermediate never hits HBM.
    compute_dtype controls the MXU operand / padded-scratch dtype (f32
    accumulation and the scale/shift/ReLU epilogue are always f32).
    """
    assert t >= 1
    w_oihw, bias, gamma, beta, run_mean, run_var = params
    eps = 1e-5
    C = w_oihw.shape[0]

    # Fold conv bias + inference-mode BatchNorm into per-channel scale/shift.
    s = gamma / jnp.sqrt(run_var + eps)
    shift = ((bias - run_mean) * s + beta).reshape(1, C).astype(jnp.float32)
    scale1 = s.reshape(1, C).astype(jnp.float32)
    scale2 = (2.0 * s).reshape(1, C).astype(jnp.float32)  # folds the (x1 + x1)

    # PyTorch OIHW -> (9*C_in, C_out); row index = (dy*3 + dx)*C_in + c_in,
    # matching the register-im2col column order built inside the kernel.
    w9 = jnp.transpose(w_oihw, (2, 3, 1, 0)).reshape(9 * C, C).astype(compute_dtype)

    # NCHW (PyTorch) -> NHWC (kernel layout: channels on the lane axis).
    x = jnp.transpose(x_nchw, (0, 2, 3, 1))
    N, H, W, _ = x.shape

    TR = min(row_block, H)
    assert TR >= 2 and H % TR == 0, (H, TR)   # TODO(synk): support ragged row tiles
    NR = H // TR

    kernel = functools.partial(_recurrent_block_kernel,
                               TR=TR, NR=NR, H=H, W=W, C=C)

    # Explicit VMEM budget from the actual block / scratch sizes (+ headroom
    # for the double-buffered blocks and the in-register im2col temporaries).
    csize = jnp.dtype(compute_dtype).itemsize
    xsize = x.dtype.itemsize
    vmem_bytes = (2 * H * W * C * xsize                 # resident input block (x2)
                  + 2 * TR * W * C * xsize              # output tile (x2)
                  + (TR + 4) * (W + 2) * C * csize      # padded scratch
                  + 2 * (TR + 2) * W * 9 * C * csize    # im2col value temporaries
                  + 2 * 9 * C * C * csize               # weights (x2)
                  + 6 * C * 4)                          # scale/shift
    vmem_limit = int(min(max(2 * vmem_bytes, 32 * 1024 * 1024), 100 * 1024 * 1024))

    out = pl.pallas_call(
        kernel,
        out_shape=jax.ShapeDtypeStruct((N, H, W, C), x.dtype),
        grid=(N, NR),
        in_specs=[
            # Full image; block index constant along j => stays resident, no
            # per-row-tile re-DMA.
            pl.BlockSpec((None, H, W, C), lambda n, j: (n, 0, 0, 0)),
            pl.BlockSpec((9 * C, C), lambda n, j: (0, 0)),   # weights
            pl.BlockSpec((1, C), lambda n, j: (0, 0)),       # scale1
            pl.BlockSpec((1, C), lambda n, j: (0, 0)),       # scale2 (2x folded)
            pl.BlockSpec((1, C), lambda n, j: (0, 0)),       # shift
        ],
        out_specs=pl.BlockSpec((None, TR, W, C), lambda n, j: (n, j, 0, 0)),
        scratch_shapes=[
            pltpu.VMEM((TR + 4, W + 2, C), compute_dtype),   # padded buffer
        ],
        compiler_params=pltpu.CompilerParams(
            dimension_semantics=("parallel", "parallel"),
            vmem_limit_bytes=vmem_limit),
    )(x, w9, scale1, scale2, shift)

    # NHWC -> NCHW to match the PyTorch output convention.
    return jnp.transpose(out, (0, 3, 1, 2))


def _reference_forward(x_nchw, params):
    """Pure-JAX (XLA) reference for correctness checking."""
    w_oihw, bias, gamma, beta, run_mean, run_var = params
    eps = 1e-5

    def conv_bn_relu_ref(x):
        y = lax.conv_general_dilated(
            x, w_oihw, window_strides=(1, 1), padding=((1, 1), (1, 1)),
            dimension_numbers=("NCHW", "OIHW", "NCHW"))
        y = y + bias.reshape(1, -1, 1, 1)
        y = (y - run_mean.reshape(1, -1, 1, 1)) / jnp.sqrt(
            run_var.reshape(1, -1, 1, 1) + eps)
        y = y * gamma.reshape(1, -1, 1, 1) + beta.reshape(1, -1, 1, 1)
        return jnp.maximum(y, 0.0)

    x1 = conv_bn_relu_ref(x_nchw)
    return conv_bn_relu_ref(x1 + x1)


if __name__ == "__main__":
    key = jax.random.PRNGKey(0)
    k_x, k_w, k_b, k_g, k_bt, k_rm, k_rv = jax.random.split(key, 7)

    N, C, H, W = 2, 4, 16, 16          # out_ch = 4, t = 2
    x = jax.random.normal(k_x, (N, C, H, W), jnp.float32)

    # Deterministic synthetic parameters (Conv2d + BatchNorm2d shapes).
    fan_in = C * 3 * 3
    w = jax.random.uniform(k_w, (C, C, 3, 3), jnp.float32,
                           -1.0 / jnp.sqrt(fan_in), 1.0 / jnp.sqrt(fan_in))
    b = jax.random.uniform(k_b, (C,), jnp.float32,
                           -1.0 / jnp.sqrt(fan_in), 1.0 / jnp.sqrt(fan_in))
    gamma = 1.0 + 0.1 * jax.random.normal(k_g, (C,), jnp.float32)
    beta = 0.1 * jax.random.normal(k_bt, (C,), jnp.float32)
    run_mean = 0.1 * jax.random.normal(k_rm, (C,), jnp.float32)
    run_var = jnp.abs(1.0 + 0.1 * jax.random.normal(k_rv, (C,), jnp.float32))
    params = (w, b, gamma, beta, run_mean, run_var)

    ref = jax.block_until_ready(_reference_forward(x, params))

    # Exact (f32) path, multi-row-tile grid (exercises the halo recompute).
    out_f32_tiled = jax.block_until_ready(
        recurrent_block_forward(x, params, t=2, row_block=8,
                                compute_dtype=jnp.float32))
    assert out_f32_tiled.shape == (N, C, H, W)
    assert jnp.allclose(out_f32_tiled, ref, atol=1e-4, rtol=1e-4), (
        float(jnp.max(jnp.abs(out_f32_tiled - ref))))

    # Exact (f32) path, single row tile (exercises the NR == 1 boundary case).
    out_f32_full = jax.block_until_ready(
        recurrent_block_forward(x, params, t=2, row_block=32,
                                compute_dtype=jnp.float32))
    assert jnp.allclose(out_f32_full, ref, atol=1e-4, rtol=1e-4), (
        float(jnp.max(jnp.abs(out_f32_full - ref))))

    # Default path: bf16 MXU operands / scratch with f32 accumulation.
    out_bf16 = jax.block_until_ready(recurrent_block_forward(x, params, t=2))
    assert jnp.allclose(out_bf16, ref, atol=1e-1, rtol=1e-1), (
        float(jnp.max(jnp.abs(out_bf16 - ref))))

    print("KERNEL_OK")
</pallas_src>

<mosaic_0001>
module attributes {stable_mosaic.version = 11 : i64} {
  func.func @_recurrent_block_kernel(%arg0: i32, %arg1: i32, %arg2: memref<1x16x16x4xf32, #tpu.memory_space<vmem>>, %arg3: memref<36x4xf32, #tpu.memory_space<vmem>>, %arg4: memref<1x4xf32, #tpu.memory_space<vmem>>, %arg5: memref<1x4xf32, #tpu.memory_space<vmem>>, %arg6: memref<1x4xf32, #tpu.memory_space<vmem>>, %arg7: memref<1x8x16x4xf32, #tpu.memory_space<vmem>>, %arg8: memref<12x18x4xf32, #tpu.memory_space<vmem>>) attributes {dimension_semantics = [#tpu.dimension_semantics<parallel>, #tpu.dimension_semantics<parallel>], iteration_bounds = array<i64: 2, 2>, scalar_prefetch = 0 : i64, scratch_operands = 1 : i64, tpu.core_type = #tpu.core_type<tc>, window_params = [{transform_indices = @transform_0, window_bounds = array<i64: 1, 16, 16, 4>}, {pipeline_mode = #tpu.pipeline_mode<synchronous>, transform_indices = @transform_1, window_bounds = array<i64: 36, 4>}, {pipeline_mode = #tpu.pipeline_mode<synchronous>, transform_indices = @transform_2, window_bounds = array<i64: 1, 4>}, {pipeline_mode = #tpu.pipeline_mode<synchronous>, transform_indices = @transform_3, window_bounds = array<i64: 1, 4>}, {pipeline_mode = #tpu.pipeline_mode<synchronous>, transform_indices = @transform_4, window_bounds = array<i64: 1, 4>}, {transform_indices = @transform_5, window_bounds = array<i64: 1, 8, 16, 4>}]} {
    %c8_i32 = arith.constant 8 : i32
    %0 = arith.muli %arg1, %c8_i32 : i32
    %1 = tpu.assume_multiple %0, 8 : i32
    %cst = arith.constant 0.000000e+00 : f32
    %2 = vector.broadcast %cst : f32 to vector<12x1x4xf32>
    %c0 = arith.constant 0 : index
    %c0_0 = arith.constant 0 : index
    %c0_1 = arith.constant 0 : index
    %3 = vector.load %arg8[%c0, %c0_0, %c0_1] : memref<12x18x4xf32, #tpu.memory_space<vmem>>, vector<12x1x4xf32>
    tpu.vector_store %arg8[%c0, %c0_0, %c0_1], %2 {strides = array<i32>} : memref<12x18x4xf32, #tpu.memory_space<vmem>>, vector<12x1x4xf32>,
    %cst_2 = arith.constant 0.000000e+00 : f32
    %4 = vector.broadcast %cst_2 : f32 to vector<12x1x4xf32>
    %c0_3 = arith.constant 0 : index
    %c17 = arith.constant 17 : index
    %c0_4 = arith.constant 0 : index
    %5 = vector.load %arg8[%c0_3, %c17, %c0_4] : memref<12x18x4xf32, #tpu.memory_space<vmem>>, vector<12x1x4xf32>
    tpu.vector_store %arg8[%c0_3, %c17, %c0_4], %4 {strides = array<i32>} : memref<12x18x4xf32, #tpu.memory_space<vmem>>, vector<12x1x4xf32>,
    %cst_5 = arith.constant 0.000000e+00 : f32
    %6 = vector.broadcast %cst_5 : f32 to vector<2x18x4xf32>
    %c0_6 = arith.constant 0 : index
    %c0_7 = arith.constant 0 : index
    %c0_8 = arith.constant 0 : index
    %7 = vector.load %arg8[%c0_6, %c0_7, %c0_8] : memref<12x18x4xf32, #tpu.memory_space<vmem>>, vector<2x18x4xf32>
    tpu.vector_store %arg8[%c0_6, %c0_7, %c0_8], %6 {strides = array<i32>} : memref<12x18x4xf32, #tpu.memory_space<vmem>>, vector<2x18x4xf32>,
    %cst_9 = arith.constant 0.000000e+00 : f32
    %8 = vector.broadcast %cst_9 : f32 to vector<2x18x4xf32>
    %c10 = arith.constant 10 : index
    %c0_10 = arith.constant 0 : index
    %c0_11 = arith.constant 0 : index
    %9 = vector.load %arg8[%c10, %c0_10, %c0_11] : memref<12x18x4xf32, #tpu.memory_space<vmem>>, vector<2x18x4xf32>
    tpu.vector_store %arg8[%c10, %c0_10, %c0_11], %8 {strides = array<i32>} : memref<12x18x4xf32, #tpu.memory_space<vmem>>, vector<2x18x4xf32>,
    %c0_12 = arith.constant 0 : index
    %10 = arith.index_cast %1 : i32 to index
    %c0_13 = arith.constant 0 : index
    %c0_14 = arith.constant 0 : index
    %11 = vector.load %arg2[%c0_12, %10, %c0_13, %c0_14] : memref<1x16x16x4xf32, #tpu.memory_space<vmem>>, vector<1x8x16x4xf32>
    %12 = vector.shape_cast %11 : vector<1x8x16x4xf32> to vector<8x16x4xf32>
    %c2 = arith.constant 2 : index
    %c1 = arith.constant 1 : index
    %c0_15 = arith.constant 0 : index
    %13 = vector.load %arg8[%c2, %c1, %c0_15] : memref<12x18x4xf32, #tpu.memory_space<vmem>>, vector<8x16x4xf32>
    tpu.vector_store %arg8[%c2, %c1, %c0_15], %12 {strides = array<i32>} : memref<12x18x4xf32, #tpu.memory_space<vmem>>, vector<8x16x4xf32>,
    %c0_i32 = arith.constant 0 : i32
    %14 = arith.cmpi sgt, %arg1, %c0_i32 : i32
    %15 = arith.extui %14 : i1 to i32
    %c0_i32_16 = arith.constant 0 : i32
    %16 = arith.cmpi ne, %15, %c0_i32_16 : i32
    scf.if %16 {
      %c2_i32 = arith.constant 2 : i32
      %89 = arith.subi %1, %c2_i32 : i32
      %c0_97 = arith.constant 0 : index
      %90 = arith.index_cast %89 : i32 to index
      %c0_98 = arith.constant 0 : index
      %c0_99 = arith.constant 0 : index
      %91 = vector.load %arg2[%c0_97, %90, %c0_98, %c0_99] : memref<1x16x16x4xf32, #tpu.memory_space<vmem>>, vector<1x2x16x4xf32>
      %92 = vector.shape_cast %91 : vector<1x2x16x4xf32> to vector<2x16x4xf32>
      %c0_100 = arith.constant 0 : index
      %c1_101 = arith.constant 1 : index
      %c0_102 = arith.constant 0 : index
      %93 = vector.load %arg8[%c0_100, %c1_101, %c0_102] : memref<12x18x4xf32, #tpu.memory_space<vmem>>, vector<2x16x4xf32>
      tpu.vector_store %arg8[%c0_100, %c1_101, %c0_102], %92 {strides = array<i32>} : memref<12x18x4xf32, #tpu.memory_space<vmem>>, vector<2x16x4xf32>,
    } else {
    }
    %c1_i32 = arith.constant 1 : i32
    %17 = arith.cmpi slt, %arg1, %c1_i32 : i32
    %18 = arith.extui %17 : i1 to i32
    %c0_i32_17 = arith.constant 0 : i32
    %19 = arith.cmpi ne, %18, %c0_i32_17 : i32
    scf.if %19 {
      %c8_i32_97 = arith.constant 8 : i32
      %89 = arith.addi %1, %c8_i32_97 : i32
      %c0_98 = arith.constant 0 : index
      %90 = arith.index_cast %89 : i32 to index
      %c0_99 = arith.constant 0 : index
      %c0_100 = arith.constant 0 : index
      %91 = vector.load %arg2[%c0_98, %90, %c0_99, %c0_100] : memref<1x16x16x4xf32, #tpu.memory_space<vmem>>, vector<1x2x16x4xf32>
      %92 = vector.shape_cast %91 : vector<1x2x16x4xf32> to vector<2x16x4xf32>
      %c10_101 = arith.constant 10 : index
      %c1_102 = arith.constant 1 : index
      %c0_103 = arith.constant 0 : index
      %93 = vector.load %arg8[%c10_101, %c1_102, %c0_103] : memref<12x18x4xf32, #tpu.memory_space<vmem>>, vector<2x16x4xf32>
      tpu.vector_store %arg8[%c10_101, %c1_102, %c0_103], %92 {strides = array<i32>} : memref<12x18x4xf32, #tpu.memory_space<vmem>>, vector<2x16x4xf32>,
    } else {
    }
    %c0_18 = arith.constant 0 : index
    %c0_19 = arith.constant 0 : index
    %20 = vector.load %arg6[%c0_18, %c0_19] : memref<1x4xf32, #tpu.memory_space<vmem>>, vector<1x4xf32>
    %c0_20 = arith.constant 0 : index
    %c0_21 = arith.constant 0 : index
    %21 = vector.load %arg4[%c0_20, %c0_21] : memref<1x4xf32, #tpu.memory_space<vmem>>, vector<1x4xf32>
    %c0_22 = arith.constant 0 : index
    %c0_23 = arith.constant 0 : index
    %c0_24 = arith.constant 0 : index
    %22 = vector.load %arg8[%c0_22, %c0_23, %c0_24] : memref<12x18x4xf32, #tpu.memory_space<vmem>>, vector<10x16x4xf32>
    %23 = vector.shape_cast %22 : vector<10x16x4xf32> to vector<160x4xf32>
    %c0_25 = arith.constant 0 : index
    %c1_26 = arith.constant 1 : index
    %c0_27 = arith.constant 0 : index
    %24 = vector.load %arg8[%c0_25, %c1_26, %c0_27] : memref<12x18x4xf32, #tpu.memory_space<vmem>>, vector<10x16x4xf32>
    %25 = vector.shape_cast %24 : vector<10x16x4xf32> to vector<160x4xf32>
    %c0_28 = arith.constant 0 : index
    %c2_29 = arith.constant 2 : index
    %c0_30 = arith.constant 0 : index
    %26 = vector.load %arg8[%c0_28, %c2_29, %c0_30] : memref<12x18x4xf32, #tpu.memory_space<vmem>>, vector<10x16x4xf32>
    %27 = vector.shape_cast %26 : vector<10x16x4xf32> to vector<160x4xf32>
    %c1_31 = arith.constant 1 : index
    %c0_32 = arith.constant 0 : index
    %c0_33 = arith.constant 0 : index
    %28 = vector.load %arg8[%c1_31, %c0_32, %c0_33] : memref<12x18x4xf32, #tpu.memory_space<vmem>>, vector<10x16x4xf32>
    %29 = vector.shape_cast %28 : vector<10x16x4xf32> to vector<160x4xf32>
    %c1_34 = arith.constant 1 : index
    %c1_35 = arith.constant 1 : index
    %c0_36 = arith.constant 0 : index
    %30 = vector.load %arg8[%c1_34, %c1_35, %c0_36] : memref<12x18x4xf32, #tpu.memory_space<vmem>>, vector<10x16x4xf32>
    %31 = vector.shape_cast %30 : vector<10x16x4xf32> to vector<160x4xf32>
    %c1_37 = arith.constant 1 : index
    %c2_38 = arith.constant 2 : index
    %c0_39 = arith.constant 0 : index
    %32 = vector.load %arg8[%c1_37, %c2_38, %c0_39] : memref<12x18x4xf32, #tpu.memory_space<vmem>>, vector<10x16x4xf32>
    %33 = vector.shape_cast %32 : vector<10x16x4xf32> to vector<160x4xf32>
    %c2_40 = arith.constant 2 : index
    %c0_41 = arith.constant 0 : index
    %c0_42 = arith.constant 0 : index
    %34 = vector.load %arg8[%c2_40, %c0_41, %c0_42] : memref<12x18x4xf32, #tpu.memory_space<vmem>>, vector<10x16x4xf32>
    %35 = vector.shape_cast %34 : vector<10x16x4xf32> to vector<160x4xf32>
    %c2_43 = arith.constant 2 : index
    %c1_44 = arith.constant 1 : index
    %c0_45 = arith.constant 0 : index
    %36 = vector.load %arg8[%c2_43, %c1_44, %c0_45] : memref<12x18x4xf32, #tpu.memory_space<vmem>>, vector<10x16x4xf32>
    %37 = vector.shape_cast %36 : vector<10x16x4xf32> to vector<160x4xf32>
    %c2_46 = arith.constant 2 : index
    %c2_47 = arith.constant 2 : index
    %c0_48 = arith.constant 0 : index
    %38 = vector.load %arg8[%c2_46, %c2_47, %c0_48] : memref<12x18x4xf32, #tpu.memory_space<vmem>>, vector<10x16x4xf32>
    %39 = vector.shape_cast %38 : vector<10x16x4xf32> to vector<160x4xf32>
    %40 = tpu.concatenate %23, %25, %27, %29, %31, %33, %35, %37, %39 in 1 : vector<160x4xf32>, vector<160x4xf32>, vector<160x4xf32>, vector<160x4xf32>, vector<160x4xf32>, vector<160x4xf32>, vector<160x4xf32>, vector<160x4xf32>, vector<160x4xf32> -> vector<160x36xf32>
    %c0_49 = arith.constant 0 : index
    %c0_50 = arith.constant 0 : index
    %41 = vector.load %arg3[%c0_49, %c0_50] : memref<36x4xf32, #tpu.memory_space<vmem>>, vector<36x4xf32>
    %cst_51 = arith.constant dense<0.000000e+00> : vector<160x4xf32>
    %42 = tpu.matmul %40, %41, %cst_51 {dimension_numbers = #tpu.dot_dimension_numbers<[1], [0], [0], [1], [0, 0, 1, 1], [], []>} : vector<160x36xf32>, vector<36x4xf32>, vector<160x4xf32> -> vector<160x4xf32>
    %43 = vector.broadcast %21 : vector<1x4xf32> to vector<160x4xf32>
    %44 = arith.mulf %42, %43 : vector<160x4xf32>
    %45 = vector.broadcast %20 : vector<1x4xf32> to vector<160x4xf32>
    %46 = arith.addf %44, %45 : vector<160x4xf32>
    %cst_52 = arith.constant 0.000000e+00 : f32
    %47 = vector.broadcast %cst_52 : f32 to vector<160x4xf32>
    %48 = arith.maximumf %46, %47 : vector<160x4xf32>
    %49 = vector.shape_cast %48 : vector<160x4xf32> to vector<10x16x4xf32>
    %c0_53 = arith.constant 0 : index
    %c1_54 = arith.constant 1 : index
    %c0_55 = arith.constant 0 : index
    %50 = vector.load %arg8[%c0_53, %c1_54, %c0_55] : memref<12x18x4xf32, #tpu.memory_space<vmem>>, vector<10x16x4xf32>
    tpu.vector_store %arg8[%c0_53, %c1_54, %c0_55], %49 {strides = array<i32>} : memref<12x18x4xf32, #tpu.memory_space<vmem>>, vector<10x16x4xf32>,
    %c0_i32_56 = arith.constant 0 : i32
    %51 = arith.cmpi eq, %arg1, %c0_i32_56 : i32
    %52 = arith.extui %51 : i1 to i32
    %c0_i32_57 = arith.constant 0 : i32
    %53 = arith.cmpi ne, %52, %c0_i32_57 : i32
    scf.if %53 {
      %cst_97 = arith.constant 0.000000e+00 : f32
      %89 = vector.broadcast %cst_97 : f32 to vector<1x16x4xf32>
      %c0_98 = arith.constant 0 : index
      %c1_99 = arith.constant 1 : index
      %c0_100 = arith.constant 0 : index
      %90 = vector.load %arg8[%c0_98, %c1_99, %c0_100] : memref<12x18x4xf32, #tpu.memory_space<vmem>>, vector<1x16x4xf32>
      tpu.vector_store %arg8[%c0_98, %c1_99, %c0_100], %89 {strides = array<i32>} : memref<12x18x4xf32, #tpu.memory_space<vmem>>, vector<1x16x4xf32>,
    } else {
    }
    %c1_i32_58 = arith.constant 1 : i32
    %54 = arith.cmpi eq, %arg1, %c1_i32_58 : i32
    %55 = arith.extui %54 : i1 to i32
    %c0_i32_59 = arith.constant 0 : i32
    %56 = arith.cmpi ne, %55, %c0_i32_59 : i32
    scf.if %56 {
      %cst_97 = arith.constant 0.000000e+00 : f32
      %89 = vector.broadcast %cst_97 : f32 to vector<1x16x4xf32>
      %c9 = arith.constant 9 : index
      %c1_98 = arith.constant 1 : index
      %c0_99 = arith.constant 0 : index
      %90 = vector.load %arg8[%c9, %c1_98, %c0_99] : memref<12x18x4xf32, #tpu.memory_space<vmem>>, vector<1x16x4xf32>
      tpu.vector_store %arg8[%c9, %c1_98, %c0_99], %89 {strides = array<i32>} : memref<12x18x4xf32, #tpu.memory_space<vmem>>, vector<1x16x4xf32>,
    } else {
    }
    %c0_60 = arith.constant 0 : index
    %c0_61 = arith.constant 0 : index
    %57 = vector.load %arg5[%c0_60, %c0_61] : memref<1x4xf32, #tpu.memory_space<vmem>>, vector<1x4xf32>
    %c0_62 = arith.constant 0 : index
    %c0_63 = arith.constant 0 : index
    %c0_64 = arith.constant 0 : index
    %58 = vector.load %arg8[%c0_62, %c0_63, %c0_64] : memref<12x18x4xf32, #tpu.memory_space<vmem>>, vector<8x16x4xf32>
    %59 = vector.shape_cast %58 : vector<8x16x4xf32> to vector<128x4xf32>
    %c0_65 = arith.constant 0 : index
    %c1_66 = arith.constant 1 : index
    %c0_67 = arith.constant 0 : index
    %60 = vector.load %arg8[%c0_65, %c1_66, %c0_67] : memref<12x18x4xf32, #tpu.memory_space<vmem>>, vector<8x16x4xf32>
    %61 = vector.shape_cast %60 : vector<8x16x4xf32> to vector<128x4xf32>
    %c0_68 = arith.constant 0 : index
    %c2_69 = arith.constant 2 : index
    %c0_70 = arith.constant 0 : index
    %62 = vector.load %arg8[%c0_68, %c2_69, %c0_70] : memref<12x18x4xf32, #tpu.memory_space<vmem>>, vector<8x16x4xf32>
    %63 = vector.shape_cast %62 : vector<8x16x4xf32> to vector<128x4xf32>
    %c1_71 = arith.constant 1 : index
    %c0_72 = arith.constant 0 : index
    %c0_73 = arith.constant 0 : index
    %64 = vector.load %arg8[%c1_71, %c0_72, %c0_73] : memref<12x18x4xf32, #tpu.memory_space<vmem>>, vector<8x16x4xf32>
    %65 = vector.shape_cast %64 : vector<8x16x4xf32> to vector<128x4xf32>
    %c1_74 = arith.constant 1 : index
    %c1_75 = arith.constant 1 : index
    %c0_76 = arith.constant 0 : index
    %66 = vector.load %arg8[%c1_74, %c1_75, %c0_76] : memref<12x18x4xf32, #tpu.memory_space<vmem>>, vector<8x16x4xf32>
    %67 = vector.shape_cast %66 : vector<8x16x4xf32> to vector<128x4xf32>
    %c1_77 = arith.constant 1 : index
    %c2_78 = arith.constant 2 : index
    %c0_79 = arith.constant 0 : index
    %68 = vector.load %arg8[%c1_77, %c2_78, %c0_79] : memref<12x18x4xf32, #tpu.memory_space<vmem>>, vector<8x16x4xf32>
    %69 = vector.shape_cast %68 : vector<8x16x4xf32> to vector<128x4xf32>
    %c2_80 = arith.constant 2 : index
    %c0_81 = arith.constant 0 : index
    %c0_82 = arith.constant 0 : index
    %70 = vector.load %arg8[%c2_80, %c0_81, %c0_82] : memref<12x18x4xf32, #tpu.memory_space<vmem>>, vector<8x16x4xf32>
    %71 = vector.shape_cast %70 : vector<8x16x4xf32> to vector<128x4xf32>
    %c2_83 = arith.constant 2 : index
    %c1_84 = arith.constant 1 : index
    %c0_85 = arith.constant 0 : index
    %72 = vector.load %arg8[%c2_83, %c1_84, %c0_85] : memref<12x18x4xf32, #tpu.memory_space<vmem>>, vector<8x16x4xf32>
    %73 = vector.shape_cast %72 : vector<8x16x4xf32> to vector<128x4xf32>
    %c2_86 = arith.constant 2 : index
    %c2_87 = arith.constant 2 : index
    %c0_88 = arith.constant 0 : index
    %74 = vector.load %arg8[%c2_86, %c2_87, %c0_88] : memref<12x18x4xf32, #tpu.memory_space<vmem>>, vector<8x16x4xf32>
    %75 = vector.shape_cast %74 : vector<8x16x4xf32> to vector<128x4xf32>
    %76 = tpu.concatenate %59, %61, %63, %65, %67, %69, %71, %73, %75 in 1 : vector<128x4xf32>, vector<128x4xf32>, vector<128x4xf32>, vector<128x4xf32>, vector<128x4xf32>, vector<128x4xf32>, vector<128x4xf32>, vector<128x4xf32>, vector<128x4xf32> -> vector<128x36xf32>
    %c0_89 = arith.constant 0 : index
    %c0_90 = arith.constant 0 : index
    %77 = vector.load %arg3[%c0_89, %c0_90] : memref<36x4xf32, #tpu.memory_space<vmem>>, vector<36x4xf32>
    %cst_91 = arith.constant dense<0.000000e+00> : vector<128x4xf32>
    %78 = tpu.matmul %76, %77, %cst_91 {dimension_numbers = #tpu.dot_dimension_numbers<[1], [0], [0], [1], [0, 0, 1, 1], [], []>} : vector<128x36xf32>, vector<36x4xf32>, vector<128x4xf32> -> vector<128x4xf32>
    %79 = vector.broadcast %57 : vector<1x4xf32> to vector<128x4xf32>
    %80 = arith.mulf %78, %79 : vector<128x4xf32>
    %81 = vector.broadcast %20 : vector<1x4xf32> to vector<128x4xf32>
    %82 = arith.addf %80, %81 : vector<128x4xf32>
    %cst_92 = arith.constant 0.000000e+00 : f32
    %83 = vector.broadcast %cst_92 : f32 to vector<128x4xf32>
    %84 = arith.maximumf %82, %83 : vector<128x4xf32>
    %85 = vector.shape_cast %84 : vector<128x4xf32> to vector<8x16x4xf32>
    %c0_93 = arith.constant 0 : index
    %c0_94 = arith.constant 0 : index
    %c0_95 = arith.constant 0 : index
    %c0_96 = arith.constant 0 : index
    %86 = vector.load %arg7[%c0_93, %c0_94, %c0_95, %c0_96] : memref<1x8x16x4xf32, #tpu.memory_space<vmem>>, vector<1x8x16x4xf32>
    %87 = vector.shape_cast %86 : vector<1x8x16x4xf32> to vector<8x16x4xf32>
    %88 = vector.shape_cast %85 : vector<8x16x4xf32> to vector<1x8x16x4xf32>
    tpu.vector_store %arg7[%c0_93, %c0_94, %c0_95, %c0_96], %88 {strides = array<i32>} : memref<1x8x16x4xf32, #tpu.memory_space<vmem>>, vector<1x8x16x4xf32>,
    return
  }
  func.func @transform_0(%arg0: i32, %arg1: i32) -> (i32, i32, i32, i32) {
    %c0_i32 = arith.constant 0 : i32
    %c0_i32_0 = arith.constant 0 : i32
    %c0_i32_1 = arith.constant 0 : i32
    %c0_i32_2 = arith.constant 0 : i32
    return %arg0, %c0_i32, %c0_i32_0, %c0_i32_1 : i32, i32, i32, i32
  }
  func.func @transform_1(%arg0: i32, %arg1: i32) -> (i32, i32) {
    %c0_i32 = arith.constant 0 : i32
    %c0_i32_0 = arith.constant 0 : i32
    %c0_i32_1 = arith.constant 0 : i32
    return %c0_i32, %c0_i32_0 : i32, i32
  }
  func.func @transform_2(%arg0: i32, %arg1: i32) -> (i32, i32) {
    %c0_i32 = arith.constant 0 : i32
    %c0_i32_0 = arith.constant 0 : i32
    %c0_i32_1 = arith.constant 0 : i32
    return %c0_i32, %c0_i32_0 : i32, i32
  }
  func.func @transform_3(%arg0: i32, %arg1: i32) -> (i32, i32) {
    %c0_i32 = arith.constant 0 : i32
    %c0_i32_0 = arith.constant 0 : i32
    %c0_i32_1 = arith.constant 0 : i32
    return %c0_i32, %c0_i32_0 : i32, i32
  }
  func.func @transform_4(%arg0: i32, %arg1: i32) -> (i32, i32) {
    %c0_i32 = arith.constant 0 : i32
    %c0_i32_0 = arith.constant 0 : i32
    %c0_i32_1 = arith.constant 0 : i32
    return %c0_i32, %c0_i32_0 : i32, i32
  }
  func.func @transform_5(%arg0: i32, %arg1: i32) -> (i32, i32, i32, i32) {
    %c0_i32 = arith.constant 0 : i32
    %c0_i32_0 = arith.constant 0 : i32
    %c0_i32_1 = arith.constant 0 : i32
    return %arg0, %arg1, %c0_i32, %c0_i32_0 : i32, i32, i32, i32
  }
}

</mosaic_0001>

<bundles_post_ra>
// kernel: tpu_custom_call.1
= control target key start
LH: loop header
LB: loop body
LE: loop exit
PB: predicated region body
PF: predicated region fallthrough
CT: control target
= control target key end

     0   :  { %s3179_s18 = smov 0   ;;  %s3181_s19 = smov 0   ;;  %s4471_s0 = inlined_call_operand.vmem [shape: f32[2,16,16,4], index: 0, kind: input, shape index: {}]   ;;  %s4472_s1 = inlined_call_operand.vmem [shape: f32[36,4], index: 1, kind: input, shape index: {}]   ;;  %s4473_s2 = inlined_call_operand.vmem [shape: f32[1,4], index: 2, kind: input, shape index: {}]   ;;  %s4474_s3 = inlined_call_operand.vmem [shape: f32[1,4], index: 3, kind: input, shape index: {}]   ;;  %s4475_s4 = inlined_call_operand.vmem [shape: f32[1,4], index: 4, kind: input, shape index: {}]   ;;  %s4476_s5 = inlined_call_operand.vmem [shape: f32[2,16,16,4], index: 5, kind: output, shape index: {}]  }
   0x1   :  { %s3183_s20 = smov 0   ;;  %s3185_s21 = smov 0  }
   0x2   :  { %s3187_s22 = smov 0  }
   0x3 LB: > { %s24_s23 = sadd.s32 1, %s3128_s20  ;;  %s27_s24 = sadd.s32 1, %s3132_s21  ;;  %s3136_s22 = sphi %s3187_s22, %s15_s22   ;;  %s3132_s21 = sphi %s3185_s21, %s4480_s21   ;;  %s3128_s20 = sphi %s3183_s20, %s4479_s20   ;;  %s3124_s19 = sphi %s3181_s19, %s4478_s19   ;;  %s3120_s18 = sphi %s3179_s18, %s4477_s18  }
   0x4   : > { %p25_p0 = scmp.ge.s32.totalorder %s24_s23, 2  ;;  %p2844_p1 = scmp.ge.s32.totalorder %s3136_s22, 1 }
   0x5   : > { %p201_p2 = scmp.lt.s32.totalorder %s3136_s22, 5 }
   0x6   : > { %s4482_s23 = smov (%p25_p0, %s24_s23), 0  ;;  %s4484_s24 = smov (!%p25_p0, %s27_s24), %s3132_s21 }
   0x7   : > { %p202_p3 = pnand %p2844_p1, %p201_p2  ;;  %p29_p4 = scmp.ge.s32.totalorder %s4484_s24, 2 }
   0x8   : > { %vm251_vm0 = vcmask (!%p202_p3), 24576   ;;  %vm276_vm1 = vcmask (!%p202_p3), 31744   ;;  %vm279_vm2 = vcmask (!%p202_p3), 25600   ;;  %p234_p5 = scmp.lt.s32.totalorder (!%p202_p3), %s3124_s19, 1  ;;  %s3215_s25 = sshll.u32 (!%p202_p3), %s3120_s18, 3  ;;  %v3138_v0 = vmov (!%p202_p3), 0.0  }
   0x9   : > { %s4486_s24 = smov (%p29_p4, %s4484_s24), 0  ;;  %205 = sbr.rel (%p202_p3) target bundleno = 1302 (0x516), region = 40 }
   0xa   : > { %252 = vst.msk [vmem:[#allocation2] sm:$0x1] (!%p202_p3), %vm251_vm0, %v3138_v0  ;;  %253 = vst.msk [vmem:[#allocation2 + $0x18] sm:$0x1] (!%p202_p3), %vm251_vm0, %v3138_v0  ;;  %p242_p6 = scmp.lt.s32.totalorder (!%p202_p3), %s3215_s25, 15  ;;  %s2909_s26 = sshll.u32 (!%p202_p3), %s3120_s18, 7 }
   0xb   : > { %254 = vst.msk [vmem:[#allocation2 + $0x30] sm:$0x1] (!%p202_p3), %vm251_vm0, %v3138_v0  ;;  %255 = vst.msk [vmem:[#allocation2 + $0x48] sm:$0x1] (!%p202_p3), %vm251_vm0, %v3138_v0  ;;  %p2853_p7 = scmp.le.s32.totalorder (!%p202_p3), %s3120_s18, 0 }
   0xc   : > { %256 = vst.msk [vmem:[#allocation2 + $0x60] sm:$0x1] (!%p202_p3), %vm251_vm0, %v3138_v0  ;;  %257 = vst.msk [vmem:[#allocation2 + $0x78] sm:$0x1] (!%p202_p3), %vm251_vm0, %v3138_v0 }
   0xd   : > { %258 = vst.msk [vmem:[#allocation2 + $0x90] sm:$0x1] (!%p202_p3), %vm251_vm0, %v3138_v0  ;;  %259 = vst.msk [vmem:[#allocation2 + $0xa8] sm:$0x1] (!%p202_p3), %vm251_vm0, %v3138_v0 }
   0xe   : > { %260 = vst.msk [vmem:[#allocation2 + $0xc0] sm:$0x1] (!%p202_p3), %vm251_vm0, %v3138_v0  ;;  %261 = vst.msk [vmem:[#allocation2 + $0xd8] sm:$0x1] (!%p202_p3), %vm251_vm0, %v3138_v0 }
   0xf   : > { %262 = vst.msk [vmem:[#allocation2 + $0xf0] sm:$0x1] (!%p202_p3), %vm251_vm0, %v3138_v0  ;;  %263 = vst.msk [vmem:[#allocation2 + $0x108] sm:$0x1] (!%p202_p3), %vm251_vm0, %v3138_v0 }
  0x10   : > { %264 = vst.msk [vmem:[#allocation2 + $0x11] sm:$0x1] %vm251_vm0, %v3138_v0  ;;  %265 = vst.msk [vmem:[#allocation2 + $0x29] sm:$0x1] %vm251_vm0, %v3138_v0  ;;  %s4488_s19 = smov (!%p234_p5, %s3124_s19), 1  ;;  %s2854_s15 = sadd.s32 (!%p2853_p7), 4294967294, %s3215_s25 }
  0x11   : > { %266 = vst.msk [vmem:[#allocation2 + $0x41] sm:$0x1] %vm251_vm0, %v3138_v0  ;;  %267 = vst.msk [vmem:[#allocation2 + $0x59] sm:$0x1] %vm251_vm0, %v3138_v0  ;;  %s243_s27 = scalar_select %p242_p6, %s3215_s25, 15 }
  0x12   : > { %268 = vst.msk [vmem:[#allocation2 + $0x71] sm:$0x1] %vm251_vm0, %v3138_v0  ;;  %269 = vst.msk [vmem:[#allocation2 + $0x89] sm:$0x1] %vm251_vm0, %v3138_v0  ;;  %s2908_s28 = sshll.u32 %s4488_s19, 8  ;;  %s2849_s29 = sshll.u32 %s4488_s19, 5 }
  0x13   : > { %270 = vst.msk [vmem:[#allocation2 + $0xa1] sm:$0x1] %vm251_vm0, %v3138_v0  ;;  %271 = vst.msk [vmem:[#allocation2 + $0xb9] sm:$0x1] %vm251_vm0, %v3138_v0  ;;  %s3262_s7 = scalar_lea.vmem %s4471_s0, %s2908_s28  ;;  %s2848_s8 = sshll.u32 %s243_s27, 1 }
  0x14   : > { %272 = vst.msk [vmem:[#allocation2 + $0xd1] sm:$0x1] %vm251_vm0, %v3138_v0  ;;  %273 = vst.msk [vmem:[#allocation2 + $0xe9] sm:$0x1] %vm251_vm0, %v3138_v0  ;;  %s246_s9 = sadd.s32 %s2849_s29, %s2848_s8  ;;  %s3265_s10 = scalar_lea.vmem %s3262_s7, %s2909_s26 }
  0x15   : > { %274 = vst.msk [vmem:[#allocation2 + $0x101] sm:$0x1] %vm251_vm0, %v3138_v0  ;;  %275 = vst.msk [vmem:[#allocation2 + $0x119] sm:$0x1] %vm251_vm0, %v3138_v0  ;;  %s2850_s11 = sshll.u32 %s246_s9, 3  ;;  %v293_v1 = vld [vmem:[%s3265_s10] sm:$0xff] }
  0x16   : > { %278 = vst.msk [vmem:[#allocation2 + $0x8] sm:$0xff] %vm276_vm1, %v3138_v0  ;;  %282 = vst.msk [vmem:[#allocation2 + $0x20] sm:$0xff] %vm276_vm1, %v3138_v0  ;;  %v294_v2 = vld [vmem:[%s3265_s10 + $0x8] sm:$0xff]  ;;  %v295_v3 = vld [vmem:[%s3265_s10 + $0x10] sm:$0xff]  ;;  %s3273_s14 = scalar_lea.vmem %s4476_s5, %s2850_s11  ;;  %s2855_s16 = sshll.u32 (!%p2853_p7), %s2854_s15, 4 }
  0x17   : > { %286 = vst.msk [vmem:[#allocation2 + $0xf8] sm:$0xff] %vm276_vm1, %v3138_v0  ;;  %289 = vst.msk [vmem:[#allocation2 + $0x110] sm:$0xff] %vm276_vm1, %v3138_v0  ;;  %v296_v4 = vld [vmem:[%s3265_s10 + $0x18] sm:$0xff]  ;;  %v297_v5 = vld [vmem:[%s3265_s10 + $0x20] sm:$0xff]  ;;  %s332_s17 = scalar_lea.vmem (!%p2853_p7), %s3262_s7, %s2855_s16 }
  0x18   : > { %277 = vst.msk [vmem:[#allocation2] sm:$0xff] %vm276_vm1, %v3138_v0  ;;  %281 = vst.msk [vmem:[#allocation2 + $0x18] sm:$0xff] %vm276_vm1, %v3138_v0  ;;  %v298_v6 = vld [vmem:[%s3265_s10 + $0x28] sm:$0xff]  ;;  %v299_v7 = vld [vmem:[%s3265_s10 + $0x30] sm:$0xff] }
  0x19   : > { %285 = vst.msk [vmem:[#allocation2 + $0xf0] sm:$0xff] %vm276_vm1, %v3138_v0  ;;  %288 = vst.msk [vmem:[#allocation2 + $0x108] sm:$0xff] %vm276_vm1, %v3138_v0  ;;  %v300_v8 = vld [vmem:[%s3265_s10 + $0x38] sm:$0xff]  ;;  %v301_v9 = vld [vmem:[%s3265_s10 + $0x40] sm:$0xff] }
  0x1a   : > { %280 = vst.msk [vmem:[#allocation2 + $0x10] sm:$0x3] %vm279_vm2, %v3138_v0  ;;  %283 = vst.msk [vmem:[#allocation2 + $0x28] sm:$0x3] %vm279_vm2, %v3138_v0  ;;  %v302_v10 = vld [vmem:[%s3265_s10 + $0x48] sm:$0xff]  ;;  %v303_v11 = vld [vmem:[%s3265_s10 + $0x50] sm:$0xff] }
  0x1b   : > { %287 = vst.msk [vmem:[#allocation2 + $0x100] sm:$0x3] %vm279_vm2, %v3138_v0  ;;  %290 = vst.msk [vmem:[#allocation2 + $0x118] sm:$0x3] %vm279_vm2, %v3138_v0  ;;  %v304_v12 = vld [vmem:[%s3265_s10 + $0x58] sm:$0xff]  ;;  %v305_v13 = vld [vmem:[%s3265_s10 + $0x60] sm:$0xff] }
  0x1c   : > { %310 = vst.msk [vmem:[#allocation2 + $0x31] sm:$0xff] %vm276_vm1, %v293_v1  ;;  %311 = vst.msk [vmem:[#allocation2 + $0x39] sm:$0xff] %vm276_vm1, %v294_v2  ;;  %v306_v14 = vld [vmem:[%s3265_s10 + $0x68] sm:$0xff]  ;;  %v307_v15 = vld [vmem:[%s3265_s10 + $0x70] sm:$0xff] }
  0x1d   : > { %312 = vst.msk [vmem:[#allocation2 + $0x49] sm:$0xff] %vm276_vm1, %v295_v3  ;;  %313 = vst.msk [vmem:[#allocation2 + $0x51] sm:$0xff] %vm276_vm1, %v296_v4  ;;  %v308_v16 = vld [vmem:[%s3265_s10 + $0x78] sm:$0xff]  ;;  %329 = sbr.rel (%p2853_p7) target bundleno = 38 (0x26), region = 44  ;;  %v333_v17 = vld [vmem:[%s332_s17] sm:$0xff] (!%p2853_p7) }
  0x1e   : > { %314 = vst.msk [vmem:[#allocation2 + $0x61] sm:$0xff] %vm276_vm1, %v297_v5  ;;  %315 = vst.msk [vmem:[#allocation2 + $0x69] sm:$0xff] %vm276_vm1, %v298_v6  ;;  %v334_v18 = vld [vmem:[%s332_s17 + $0x8] sm:$0xff] (!%p2853_p7)  ;;  %v335_v19 = vld [vmem:[%s332_s17 + $0x10] sm:$0xff] (!%p2853_p7) }
  0x1f   : > { %316 = vst.msk [vmem:[#allocation2 + $0x79] sm:$0xff] %vm276_vm1, %v299_v7  ;;  %317 = vst.msk [vmem:[#allocation2 + $0x81] sm:$0xff] %vm276_vm1, %v300_v8  ;;  %v336_v20 = vld [vmem:[%s332_s17 + $0x18] sm:$0xff] (!%p2853_p7) }
  0x20   : > { %318 = vst.msk [vmem:[#allocation2 + $0x91] sm:$0xff] %vm276_vm1, %v301_v9  ;;  %319 = vst.msk [vmem:[#allocation2 + $0x99] sm:$0xff] %vm276_vm1, %v302_v10 }
  0x21   : > { %320 = vst.msk [vmem:[#allocation2 + $0xa9] sm:$0xff] %vm276_vm1, %v303_v11  ;;  %321 = vst.msk [vmem:[#allocation2 + $0xb1] sm:$0xff] %vm276_vm1, %v304_v12 }
  0x22   : > { %322 = vst.msk [vmem:[#allocation2 + $0xc1] sm:$0xff] %vm276_vm1, %v305_v13  ;;  %323 = vst.msk [vmem:[#allocation2 + $0xc9] sm:$0xff] %vm276_vm1, %v306_v14 }
  0x23   : > { %324 = vst.msk [vmem:[#allocation2 + $0xd9] sm:$0xff] %vm276_vm1, %v307_v15  ;;  %325 = vst.msk [vmem:[#allocation2 + $0xe1] sm:$0xff] %vm276_vm1, %v308_v16 }
  0x24   : > { %337 = vst.msk [vmem:[#allocation2 + $0x1] sm:$0xff] %vm276_vm1, %v333_v17  ;;  %338 = vst.msk [vmem:[#allocation2 + $0x9] sm:$0xff] %vm276_vm1, %v334_v18 }
  0x25   : > { %339 = vst.msk [vmem:[#allocation2 + $0x19] sm:$0xff] %vm276_vm1, %v335_v19  ;;  %340 = vst.msk [vmem:[#allocation2 + $0x21] sm:$0xff] %vm276_vm1, %v336_v20 }
  0x26 PF: > { %p2856_p8 = scmp.ge.s32.totalorder %s3120_s18, 1 }
  0x27   : > { %v2859_v21 = vld [vmem:[%s3265_s10 + $0x80] sm:$0xff] (!%p2856_p8)  ;;  %v2860_v22 = vld [vmem:[%s3265_s10 + $0x88] sm:$0xff] (!%p2856_p8)  ;;  %v2861_v23 = vld [vmem:[%s3265_s10 + $0x90] sm:$0xff] (!%p2856_p8) }
  0x28   : > { %344 = sbr.rel (%p2856_p8) target bundleno = 47 (0x2f), region = 48  ;;  %352 = vst.msk [vmem:[#allocation2 + $0xf1] sm:$0xff] (!%p2856_p8), %vm276_vm1, %v2859_v21  ;;  %353 = vst.msk [vmem:[#allocation2 + $0xf9] sm:$0xff] (!%p2856_p8), %vm276_vm1, %v2860_v22  ;;  %v2862_v24 = vld [vmem:[%s3265_s10 + $0x98] sm:$0xff] (!%p2856_p8) }
  0x29   : > { %354 = vst.msk [vmem:[#allocation2 + $0x109] sm:$0xff] (!%p2856_p8), %vm276_vm1, %v2861_v23  ;;  %355 = vst.msk [vmem:[#allocation2 + $0x111] sm:$0xff] (!%p2856_p8), %vm276_vm1, %v2862_v24 }
  0x2f PF: > { %v398_v25 = vld [vmem:[#allocation2 + $0x2] sm:$0xff]  ;;  %s3139_s19 = smov 8   ;;  %s3140_s25 = smov 4   ;;  %v399_v27 = vld [vmem:[#allocation2 + $0xa] sm:$0xff]  ;;  %v3326_v30 = vld [vmem:[#allocation2 + $0x18] sm:$0xff]  ;;  %vm1412_vm3 = vcmask 1043456  }
  0x30   : > { %v378_v26 = vld [vmem:[#allocation2 + $0x1] sm:$0xff]  ;;  %639 = vrot.lane.b32.xlu1 %v398_v25, %s3139_s19  ;;  %v379_v28 = vld [vmem:[#allocation2 + $0x9] sm:$0xff]  ;;  %s3141_s26 = smov 12   ;;  %v380_v31 = vld [vmem:[#allocation2 + $0x19] sm:$0xff]  ;;  %s3142_s27 = smov 16   ;;  %vm1199_vm4 = vcmask 64512  }
  0x31   : > { %559 = vrot.lane.b32.xlu0 %v378_v26, %s3140_s25  ;;  %v3324_v29 = vld [vmem:[#allocation2 + $0x20] sm:$0xff]  ;;  %s3143_s28 = smov 20   ;;  %v3338_v34 = vld [vmem:[#allocation2 + $0x30] sm:$0xff]  ;;  %v1347_v37 = vld [vmem:[%s4472_s1 + $0x8] sm:$0xff]  ;;  %s3144_s8 = smov 24   ;;  %vm1220_vm5 = vcmask 97280  }
  0x32   : > { %v459_v32 = vld [vmem:[#allocation2 + $0x1a] sm:$0xff]  ;;  %v460_v35 = vld [vmem:[#allocation2 + $0x22] sm:$0xff]  ;;  %v1348_v39 = vld [vmem:[%s4472_s1 + $0x10] sm:$0xff]  ;;  %s3145_s13 = smov 28   ;;  %s3146_s17 = smov 32   ;;  %vm1241_vm6 = vcmask 130048  }
  0x33   : > { %v440_v33 = vld [vmem:[#allocation2 + $0x21] sm:$0xff]  ;;  %v1349_v40 = vld [vmem:[%s4472_s1 + $0x18] sm:$0xff]  ;;  %v501_v49 = vld [vmem:[#allocation2 + $0x49] sm:$0xff]  ;;  %vm1262_vm7 = vcmask 162816   ;;  %vm1283_vm8 = vcmask 195584   ;;  %vm1304_vm9 = vcmask 228352  }
  0x34   : > { %641 = vrot.lane.b32.xlu1 %v399_v27, %s3139_s19  ;;  %v1346_v36 = vld [vmem:[%s4472_s1] sm:$0xff]  ;;  %v499_v41 = vld [vmem:[#allocation2 + $0x31] sm:$0xff]  ;;  %v3035_v43 = vpack.c.bf16 %v1349_v40, %v1348_v39  ;;  %v3379_v48 = vld [vmem:[#allocation2 + $0x48] sm:$0xff]  ;;  %vm1325_vm10 = vcmask 261120   ;;  %vm1351_vm11 = vcmask 293888   ;;  %p2886_p9 = scmp.ne.s32.totalorder %s3120_s18, 0 }
  0x35   : > { %561 = vrot.lane.b32.xlu0 %v379_v28, %s3140_s25  ;;  %v3031_v38 = vpack.c.bf16 %v1347_v37, %v1346_v36  ;;  %v3358_v42 = vld [vmem:[#allocation2 + $0x38] sm:$0xff]  ;;  %v1350_v44 = vld [vmem:[%s4472_s1 + $0x20] sm:$0xf]  ;;  %v3387_v50 = vld [vmem:[#allocation2 + $0x50] sm:$0xff] }
  0x36   : > { %v519_v45 = vld [vmem:[#allocation2 + $0x32] sm:$0xff]  ;;  %v520_v47 = vld [vmem:[#allocation2 + $0x3a] sm:$0xff]  ;;  %v521_v51 = vld [vmem:[#allocation2 + $0x4a] sm:$0xff] }
  0x37   : > { %3032 = vmatprep.subr.bf16.mxu0 %v3031_v38  ;;  %v500_v46 = vld [vmem:[#allocation2 + $0x39] sm:$0xff]  ;;  %v502_v52 = vld [vmem:[#allocation2 + $0x51] sm:$0xff]  ;;  %v503_v55 = vld [vmem:[#allocation2 + $0x61] sm:$0xff] }
  0x38   : > { %721 = vrot.lane.b32.xlu1 %v3324_v29, %s3141_s26  ;;  %3034 = vmatpush3.bf16.msra.mxu0 %v3031_v38  ;;  %v522_v53 = vld [vmem:[#allocation2 + $0x52] sm:$0xff]  ;;  %v3403_v54 = vld [vmem:[#allocation2 + $0x60] sm:$0xff]  ;;  %v3411_v56 = vld [vmem:[#allocation2 + $0x68] sm:$0xff] }
  0x39   : > { %719 = vrot.lane.b32.xlu0 %v3326_v30, %s3141_s26  ;;  %3036 = vmatprep.subr.bf16.mxu0 %v3035_v43  ;;  %v523_v57 = vld [vmem:[#allocation2 + $0x62] sm:$0xff]  ;;  %v524_v59 = vld [vmem:[#allocation2 + $0x6a] sm:$0xff]  ;;  %v3427_v62 = vld [vmem:[#allocation2 + $0x78] sm:$0xff] }
  0x3a   : > { %v504_v58 = vld [vmem:[#allocation2 + $0x69] sm:$0xff]  ;;  %v505_v3 = vld [vmem:[#allocation2 + $0x79] sm:$0xff]  ;;  %v506_v10 = vld [vmem:[#allocation2 + $0x81] sm:$0xff] }
  0x3b   : > { %v3439_v4 = vld [vmem:[#allocation2 + $0x80] sm:$0xff]  ;;  %v3467_v23 = vld [vmem:[#allocation2 + $0x90] sm:$0xff]  ;;  %v359_v27 = vld [vmem:[#allocation2 + $0x8] sm:$0xff] }
  0x3c   : > { %563 = vrot.lane.b32.xlu1 %v380_v31, %s3140_s25  ;;  %3038 = vmatpush3.bf16.msra.mxu0 %v3035_v43  ;;  %v525_v9 = vld [vmem:[#allocation2 + $0x7a] sm:$0xff]  ;;  %v526_v15 = vld [vmem:[#allocation2 + $0x82] sm:$0xff]  ;;  %v507_v40 = vld [vmem:[#allocation2 + $0x91] sm:$0xff] }
  0x3d   : > { %799 = vrot.lane.b32.xlu0 %v380_v31, %s3142_s27  ;;  %2965 = vmatprep.subr.msk.mxu0 %vm1412_vm3, %v1350_v44  ;;  %v358_v18 = vld [vmem:[#allocation2] sm:$0xff] }
  0x40   : > { %879 = vrot.lane.b32.xlu1 %v459_v32, %s3143_s28  ;;  %2966 = vmatpush3.msk.msra.mxu0 %vm1412_vm3, %v1350_v44 }
  0x41   : > { %801 = vrot.lane.b32.xlu0 %v440_v33, %s3142_s27 }
  0x44   : > { %643 = vrot.lane.b32.xlu1 %v459_v32, %s3139_s19 }
  0x45   : > { %565 = vrot.lane.b32.xlu0 %v440_v33, %s3140_s25 }
  0x48   : > { %959 = vrot.lane.b32.xlu1 %v3338_v34, %s3144_s8 }
  0x49   : > { %881 = vrot.lane.b32.xlu0 %v460_v35, %s3143_s28 }
  0x4c   : > { %723 = vrot.lane.b32.xlu1 %v3338_v34, %s3141_s26 }
  0x4d   : > { %645 = vrot.lane.b32.xlu0 %v460_v35, %s3139_s19 }
  0x50   : > { %1039 = vrot.lane.b32.xlu1 %v499_v41, %s3145_s13 }
  0x51   : > { %961 = vrot.lane.b32.xlu0 %v3358_v42, %s3144_s8 }
  0x54   : > { %803 = vrot.lane.b32.xlu1 %v499_v41, %s3142_s27 }
  0x55   : > { %725 = vrot.lane.b32.xlu0 %v3358_v42, %s3141_s26 }
  0x58   : > { %1119 = vrot.lane.b32.xlu1 %v519_v45, %s3146_s17 }
  0x59   : > { %1041 = vrot.lane.b32.xlu0 %v500_v46, %s3145_s13 }
  0x5c   : > { %805 = vrot.lane.b32.xlu1 %v500_v46, %s3142_s27 }
  0x5d   : > { %567 = vrot.lane.b32.xlu0 %v499_v41, %s3140_s25  ;;  %v3489_v41 = vld [vmem:[#allocation2 + $0x98] sm:$0xff] }
  0x60   : > { %1121 = vrot.lane.b32.xlu1 %v520_v47, %s3146_s17 }
  0x61   : > { %883 = vrot.lane.b32.xlu0 %v519_v45, %s3143_s28 }
  0x64   : > { %647 = vrot.lane.b32.xlu1 %v519_v45, %s3139_s19 }
  0x65   : > { %569 = vrot.lane.b32.xlu0 %v500_v46, %s3140_s25 }
  0x68   : > { %963 = vrot.lane.b32.xlu1 %v3379_v48, %s3144_s8 }
  0x69   : > { %885 = vrot.lane.b32.xlu0 %v520_v47, %s3143_s28 }
  0x6c   : > { %727 = vrot.lane.b32.xlu1 %v3379_v48, %s3141_s26 }
  0x6d   : > { %649 = vrot.lane.b32.xlu0 %v520_v47, %s3139_s19 }
  0x70   : > { %1043 = vrot.lane.b32.xlu1 %v501_v49, %s3145_s13 }
  0x71   : > { %965 = vrot.lane.b32.xlu0 %v3387_v50, %s3144_s8 }
  0x74   : > { %807 = vrot.lane.b32.xlu1 %v501_v49, %s3142_s27 }
  0x75   : > { %729 = vrot.lane.b32.xlu0 %v3387_v50, %s3141_s26 }
  0x78   : > { %1123 = vrot.lane.b32.xlu1 %v521_v51, %s3146_s17 }
  0x79   : > { %1045 = vrot.lane.b32.xlu0 %v502_v52, %s3145_s13 }
  0x7c   : > { %809 = vrot.lane.b32.xlu1 %v502_v52, %s3142_s27 }
  0x7d   : > { %571 = vrot.lane.b32.xlu0 %v501_v49, %s3140_s25 }
  0x80   : > { %1125 = vrot.lane.b32.xlu1 %v522_v53, %s3146_s17 }
  0x81   : > { %887 = vrot.lane.b32.xlu0 %v521_v51, %s3143_s28 }
  0x84   : > { %651 = vrot.lane.b32.xlu1 %v521_v51, %s3139_s19 }
  0x85   : > { %573 = vrot.lane.b32.xlu0 %v502_v52, %s3140_s25 }
  0x88   : > { %967 = vrot.lane.b32.xlu1 %v3403_v54, %s3144_s8 }
  0x89   : > { %889 = vrot.lane.b32.xlu0 %v522_v53, %s3143_s28 }
  0x8c   : > { %731 = vrot.lane.b32.xlu1 %v3403_v54, %s3141_s26 }
  0x8d   : > { %653 = vrot.lane.b32.xlu0 %v522_v53, %s3139_s19 }
  0x90   : > { %1047 = vrot.lane.b32.xlu1 %v503_v55, %s3145_s13 }
  0x91   : > { %969 = vrot.lane.b32.xlu0 %v3411_v56, %s3144_s8 }
  0x94   : > { %811 = vrot.lane.b32.xlu1 %v503_v55, %s3142_s27 }
  0x95   : > { %733 = vrot.lane.b32.xlu0 %v3411_v56, %s3141_s26 }
  0x98   : > { %1127 = vrot.lane.b32.xlu1 %v523_v57, %s3146_s17 }
  0x99   : > { %1049 = vrot.lane.b32.xlu0 %v504_v58, %s3145_s13 }
  0x9c   : > { %813 = vrot.lane.b32.xlu1 %v504_v58, %s3142_s27 }
  0x9d   : > { %575 = vrot.lane.b32.xlu0 %v503_v55, %s3140_s25 }
  0xa0   : > { %1129 = vrot.lane.b32.xlu1 %v524_v59, %s3146_s17 }
  0xa1   : > { %891 = vrot.lane.b32.xlu0 %v523_v57, %s3143_s28 }
  0xa2   : > { %v640_v60 = vpop.permute.xlu1 %639 }
  0xa3   : > { %v560_v61 = vpop.permute.xlu0 %559 }
  0xa4   : > { %655 = vrot.lane.b32.xlu1 %v523_v57, %s3139_s19  ;;  %v1179_v19 = vsel %vm276_vm1, %v358_v18, %v560_v61  ;;  %v527_v57 = vld [vmem:[#allocation2 + $0x92] sm:$0xff] }
  0xa5   : > { %577 = vrot.lane.b32.xlu0 %v504_v58, %s3140_s25  ;;  %v1200_v22 = vsel %vm1199_vm4, %v1179_v19, %v640_v60  ;;  %v508_v58 = vld [vmem:[#allocation2 + $0x99] sm:$0xff] }
  0xa6   : > { %v3429_v63 = vpop.permute.xlu1 %641 }
  0xa7   : > { %v562_v0 = vpop.permute.xlu0 %561 }
  0xa8   : > { %971 = vrot.lane.b32.xlu1 %v3427_v62, %s3144_s8  ;;  %v1180_v33 = vsel %vm276_vm1, %v359_v27, %v562_v0  ;;  %v528_v0 = vld [vmem:[#allocation2 + $0x9a] sm:$0xff] }
  0xa9   : > { %893 = vrot.lane.b32.xlu0 %v524_v59, %s3143_s28  ;;  %v1201_v39 = vsel %vm1199_vm4, %v1180_v33, %v3429_v63 }
  0xaa   : > { %v3434_v1 = vpop.permute.xlu1 %721 }
  0xab   : > { %v720_v2 = vpop.permute.xlu0 %719  ;;  %v1222_v43 = vsel %vm1220_vm5, %v1201_v39, %v3434_v1 }
  0xac   : > { %735 = vrot.lane.b32.xlu1 %v3427_v62, %s3141_s26  ;;  %v1221_v24 = vsel %vm1220_vm5, %v1200_v22, %v720_v2  ;;  %v509_v22 = vld [vmem:[#allocation2 + $0xa9] sm:$0xff] }
  0xad   : > { %657 = vrot.lane.b32.xlu0 %v524_v59, %s3139_s19 }
  0xae   : > { %v3441_v5 = vpop.permute.xlu1 %563 }
  0xaf   : > { %v800_v6 = vpop.permute.xlu0 %799 }
  0xb0   : > { %1051 = vrot.lane.b32.xlu1 %v505_v3, %s3145_s13  ;;  %v1242_v28 = vsel %vm1241_vm6, %v1221_v24, %v800_v6  ;;  %v3552_v24 = vld [vmem:[#allocation2 + $0xb0] sm:$0xff] }
  0xb1   : > { %973 = vrot.lane.b32.xlu0 %v3439_v4, %s3144_s8 }
  0xb2   : > { %v880_v7 = vpop.permute.xlu1 %879 }
  0xb3   : > { %v802_v8 = vpop.permute.xlu0 %801  ;;  %v1263_v31 = vsel %vm1262_vm7, %v1242_v28, %v880_v7  ;;  %v1181_v7 = vsel %vm276_vm1, %v3326_v30, %v3441_v5 }
  0xb4   : > { %815 = vrot.lane.b32.xlu1 %v505_v3, %s3142_s27  ;;  %v1243_v46 = vsel %vm1241_vm6, %v1222_v43, %v802_v8  ;;  %v530_v43 = vld [vmem:[#allocation2 + $0xb2] sm:$0xff] }
  0xb5   : > { %737 = vrot.lane.b32.xlu0 %v3439_v4, %s3141_s26 }
  0xb6   : > { %v3449_v11 = vpop.permute.xlu1 %643 }
  0xb7   : > { %v3451_v12 = vpop.permute.xlu0 %565  ;;  %v1202_v8 = vsel %vm1199_vm4, %v1181_v7, %v3449_v11  ;;  %v511_v7 = vld [vmem:[#allocation2 + $0xc1] sm:$0xff] }
  0xb8   : > { %1131 = vrot.lane.b32.xlu1 %v525_v9, %s3146_s17 }
  0xb9   : > { %1053 = vrot.lane.b32.xlu0 %v506_v10, %s3145_s13 }
  0xba   : > { %v960_v13 = vpop.permute.xlu1 %959 }
  0xbb   : > { %v882_v14 = vpop.permute.xlu0 %881  ;;  %v1284_v32 = vsel %vm1283_vm8, %v1263_v31, %v960_v13 }
  0xbc   : > { %817 = vrot.lane.b32.xlu1 %v506_v10, %s3142_s27  ;;  %v1264_v47 = vsel %vm1262_vm7, %v1243_v46, %v882_v14 }
  0xbd   : > { %579 = vrot.lane.b32.xlu0 %v505_v3, %s3140_s25 }
  0xbe   : > { %v3457_v16 = vpop.permute.xlu1 %723 }
  0xbf   : > { %v3459_v17 = vpop.permute.xlu0 %645 }
  0xc0   : > { %1133 = vrot.lane.b32.xlu1 %v526_v15, %s3146_s17 }
  0xc1   : > { %895 = vrot.lane.b32.xlu0 %v525_v9, %s3143_s28 }
  0xc2   : > { %v1040_v20 = vpop.permute.xlu1 %1039 }
  0xc3   : > { %v962_v21 = vpop.permute.xlu0 %961  ;;  %v1305_v35 = vsel %vm1304_vm9, %v1284_v32, %v1040_v20  ;;  %v1182_v20 = vsel %vm276_vm1, %v3324_v29, %v3451_v12 }
  0xc4   : > { %659 = vrot.lane.b32.xlu1 %v525_v9, %s3139_s19  ;;  %v1285_v49 = vsel %vm1283_vm8, %v1264_v47, %v962_v21  ;;  %v3528_v9 = vld [vmem:[#allocation2 + $0xa8] sm:$0xff]  ;;  %v1203_v21 = vsel %vm1199_vm4, %v1182_v20, %v3459_v17 }
  0xc5   : > { %581 = vrot.lane.b32.xlu0 %v506_v10, %s3140_s25  ;;  %v1223_v10 = vsel %vm1220_vm5, %v1202_v8, %v3457_v16  ;;  %v3614_v8 = vld [vmem:[#allocation2 + $0xc8] sm:$0xff] }
  0xc6   : > { %v3470_v25 = vpop.permute.xlu1 %803 }
  0xc7   : > { %v3472_v26 = vpop.permute.xlu0 %725 }
  0xc8   : > { %975 = vrot.lane.b32.xlu1 %v3467_v23, %s3144_s8 }
  0xc9   : > { %897 = vrot.lane.b32.xlu0 %v526_v15, %s3143_s28 }
  0xca   : > { %v1120_v36 = vpop.permute.xlu1 %1119 }
  0xcb   : > { %v1042_v37 = vpop.permute.xlu0 %1041  ;;  %v1326_v38 = vsel %vm1325_vm10, %v1305_v35, %v1120_v36  ;;  %v529_v35 = vld [vmem:[#allocation2 + $0xaa] sm:$0xff] }
  0xcc   : > { %739 = vrot.lane.b32.xlu1 %v3467_v23, %s3141_s26  ;;  %2967 = vmatprep.mubr.msk.f32.mxu0 %vm1351_vm11, %v1326_v38  ;;  %v1306_v51 = vsel %vm1304_vm9, %v1285_v49, %v1042_v37  ;;  %v510_v36 = vld [vmem:[#allocation2 + $0xb1] sm:$0xff] }
  0xcd   : > { %661 = vrot.lane.b32.xlu0 %v526_v15, %s3139_s19  ;;  %v1244_v15 = vsel %vm1241_vm6, %v1223_v10, %v3470_v25  ;;  %v1224_v25 = vsel %vm1220_vm5, %v1203_v21, %v3472_v26 }
  0xce   : > { %v806_v44 = vpop.permute.xlu1 %805 }
  0xcf   : > { %v3493_v45 = vpop.permute.xlu0 %567  ;;  %v1245_v29 = vsel %vm1241_vm6, %v1224_v25, %v806_v44  ;;  %v532_v25 = vld [vmem:[#allocation2 + $0xca] sm:$0xff] }
  0xd0   : > { %1055 = vrot.lane.b32.xlu1 %v507_v40, %s3145_s13 }
  0xd1   : > { %977 = vrot.lane.b32.xlu0 %v3489_v41, %s3144_s8 }
  0xd2   : > { %v1122_v52 = vpop.permute.xlu1 %1121 }
  0xd3   : > { %v884_v53 = vpop.permute.xlu0 %883  ;;  %v1327_v55 = vsel %vm1325_vm10, %v1306_v51, %v1122_v52  ;;  %v1183_v51 = vsel %vm276_vm1, %v3338_v34, %v3493_v45 }
  0xd4   : > { %819 = vrot.lane.b32.xlu1 %v507_v40, %s3142_s27  ;;  %2968 = vmatmul.mubr.msk.f32.vlgmr.msra.gmra.mrb[0].mxu0 %vm1351_vm11, %v1327_v55  ;;  %v1265_v30 = vsel %vm1262_vm7, %v1244_v15, %v884_v53  ;;  %v3591_v53 = vld [vmem:[#allocation2 + $0xc0] sm:$0xff] }
  0xd5   : > { %741 = vrot.lane.b32.xlu0 %v3489_v41, %s3141_s26 }
  0xd6   : > { %v3507_v59 = vpop.permute.xlu1 %647 }
  0xd7   : > { %v3509_v60 = vpop.permute.xlu0 %569  ;;  %v1204_v52 = vsel %vm1199_vm4, %v1183_v51, %v3507_v59  ;;  %v513_v51 = vld [vmem:[#allocation2 + $0xd9] sm:$0xff] }
  0xd8   : > { %1135 = vrot.lane.b32.xlu1 %v527_v57, %s3146_s17 }
  0xd9   : > { %1057 = vrot.lane.b32.xlu0 %v508_v58, %s3145_s13 }
  0xda   : > { %v964_v61 = vpop.permute.xlu1 %963 }
  0xdb   : > { %v886_v63 = vpop.permute.xlu0 %885  ;;  %v1286_v5 = vsel %vm1283_vm8, %v1265_v30, %v964_v61 }
  0xdc   : > { %821 = vrot.lane.b32.xlu1 %v508_v58, %s3142_s27  ;;  %v1266_v12 = vsel %vm1262_vm7, %v1245_v29, %v886_v63 }
  0xdd   : > { %583 = vrot.lane.b32.xlu0 %v507_v40, %s3140_s25 }
  0xde   : > { %v3515_v1 = vpop.permute.xlu1 %727 }
  0xdf   : > { %v3517_v2 = vpop.permute.xlu0 %649  ;;  %v1225_v55 = vsel %vm1220_vm5, %v1204_v52, %v3515_v1  ;;  %v3676_v52 = vld [vmem:[#allocation2 + $0xe0] sm:$0xff] }
  0xe0   : > { %1137 = vrot.lane.b32.xlu1 %v528_v0, %s3146_s17 }
  0xe1   : > { %899 = vrot.lane.b32.xlu0 %v527_v57, %s3143_s28 }
  0xe2   : > { %v1044_v3 = vpop.permute.xlu1 %1043 }
  0xe3   : > { %v966_v6 = vpop.permute.xlu0 %965  ;;  %v1307_v11 = vsel %vm1304_vm9, %v1286_v5, %v1044_v3  ;;  %v1184_v3 = vsel %vm276_vm1, %v3358_v42, %v3509_v60 }
  0xe4   : > { %663 = vrot.lane.b32.xlu1 %v527_v57, %s3139_s19  ;;  %v1287_v17 = vsel %vm1283_vm8, %v1266_v12, %v966_v6  ;;  %v1205_v6 = vsel %vm1199_vm4, %v1184_v3, %v3517_v2 }
  0xe5   : > { %585 = vrot.lane.b32.xlu0 %v508_v58, %s3140_s25 }
  0xe6   : > { %v808_v13 = vpop.permute.xlu1 %807 }
  0xe7   : > { %v3532_v14 = vpop.permute.xlu0 %729  ;;  %v1246_v61 = vsel %vm1241_vm6, %v1225_v55, %v808_v13 }
  0xe8   : > { %979 = vrot.lane.b32.xlu1 %v3528_v9, %s3144_s8  ;;  %v1226_v10 = vsel %vm1220_vm5, %v1205_v6, %v3532_v14 }
  0xe9   : > { %901 = vrot.lane.b32.xlu0 %v528_v0, %s3143_s28 }
  0xea   : > { %v1124_v18 = vpop.permute.xlu1 %1123 }
  0xeb   : > { %v1046_v19 = vpop.permute.xlu0 %1045  ;;  %v1328_v16 = vsel %vm1325_vm10, %v1307_v11, %v1124_v18  ;;  %v531_v18 = vld [vmem:[#allocation2 + $0xc2] sm:$0xff] }
  0xec   : > { %743 = vrot.lane.b32.xlu1 %v3528_v9, %s3141_s26  ;;  %2970 = vmatprep.mubr.msk.f32.mxu0 %vm1351_vm11, %v1328_v16  ;;  %v1308_v31 = vsel %vm1304_vm9, %v1287_v17, %v1046_v19  ;;  %v512_v19 = vld [vmem:[#allocation2 + $0xc9] sm:$0xff] }
  0xed   : > { %665 = vrot.lane.b32.xlu0 %v528_v0, %s3139_s19 }
  0xee   : > { %v810_v27 = vpop.permute.xlu1 %809 }
  0xef   : > { %v3556_v28 = vpop.permute.xlu0 %571  ;;  %v1247_v42 = vsel %vm1241_vm6, %v1226_v10, %v810_v27  ;;  %v534_v10 = vld [vmem:[#allocation2 + $0xe2] sm:$0xff] }
  0xf0   : > { %1059 = vrot.lane.b32.xlu1 %v509_v22, %s3145_s13 }
  0xf1   : > { %981 = vrot.lane.b32.xlu0 %v3552_v24, %s3144_s8 }
  0xf2   : > { %v1126_v32 = vpop.permute.xlu1 %1125 }
  0xf3   : > { %v888_v33 = vpop.permute.xlu0 %887  ;;  %v1329_v26 = vsel %vm1325_vm10, %v1308_v31, %v1126_v32  ;;  %v1185_v31 = vsel %vm276_vm1, %v3379_v48, %v3556_v28 }
  0xf4   : > { %823 = vrot.lane.b32.xlu1 %v509_v22, %s3142_s27  ;;  %2971 = vmatmul.mubr.msk.f32.gmra.mrb[2].mxu0 %vm1351_vm11, %v1329_v26  ;;  %v1267_v63 = vsel %vm1262_vm7, %v1246_v61, %v888_v33  ;;  %v3653_v33 = vld [vmem:[#allocation2 + $0xd8] sm:$0xff] }
  0xf5   : > { %745 = vrot.lane.b32.xlu0 %v3552_v24, %s3141_s26 }
  0xf6   : > { %v3570_v37 = vpop.permute.xlu1 %651 }
  0xf7   : > { %v3572_v38 = vpop.permute.xlu0 %573  ;;  %v1206_v32 = vsel %vm1199_vm4, %v1185_v31, %v3570_v37  ;;  %v515_v31 = vld [vmem:[#allocation2 + $0xf1] sm:$0xff] }
  0xf8   : > { %1139 = vrot.lane.b32.xlu1 %v529_v35, %s3146_s17 }
  0xf9   : > { %1061 = vrot.lane.b32.xlu0 %v510_v36, %s3145_s13 }
  0xfa   : > { %v968_v39 = vpop.permute.xlu1 %967 }
  0xfb   : > { %v890_v40 = vpop.permute.xlu0 %889  ;;  %v1288_v34 = vsel %vm1283_vm8, %v1267_v63, %v968_v39 }
  0xfc   : > { %825 = vrot.lane.b32.xlu1 %v510_v36, %s3142_s27  ;;  %v1268_v60 = vsel %vm1262_vm7, %v1247_v42, %v890_v40 }
  0xfd   : > { %587 = vrot.lane.b32.xlu0 %v509_v22, %s3140_s25 }
  0xfe   : > { %v3578_v44 = vpop.permute.xlu1 %731 }
  0xff   : > { %v3580_v46 = vpop.permute.xlu0 %653  ;;  %v1227_v26 = vsel %vm1220_vm5, %v1206_v32, %v3578_v44  ;;  %v496_v32 = vld [vmem:[#allocation2 + $0xf8] sm:$0xff] }
 0x100   : > { %1141 = vrot.lane.b32.xlu1 %v530_v43, %s3146_s17 }
 0x101   : > { %903 = vrot.lane.b32.xlu0 %v529_v35, %s3143_s28 }
 0x102   : > { %v1048_v47 = vpop.permute.xlu1 %1047 }
 0x103   : > { %v970_v49 = vpop.permute.xlu0 %969  ;;  %v1309_v45 = vsel %vm1304_vm9, %v1288_v34, %v1048_v47  ;;  %v1186_v47 = vsel %vm276_vm1, %v3387_v50, %v3572_v38 }
 0x104   : > { %667 = vrot.lane.b32.xlu1 %v529_v35, %s3139_s19  ;;  %v1289_v2 = vsel %vm1283_vm8, %v1268_v60, %v970_v49  ;;  %v1207_v49 = vsel %vm1199_vm4, %v1186_v47, %v3580_v46 }
 0x105   : > { %589 = vrot.lane.b32.xlu0 %v510_v36, %s3140_s25 }
 0x106   : > { %v812_v57 = vpop.permute.xlu1 %811 }
 0x107   : > { %v3595_v58 = vpop.permute.xlu0 %733  ;;  %v1248_v39 = vsel %vm1241_vm6, %v1227_v26, %v812_v57 }
 0x108   : > { %983 = vrot.lane.b32.xlu1 %v3591_v53, %s3144_s8  ;;  %v1228_v55 = vsel %vm1220_vm5, %v1207_v49, %v3595_v58 }
 0x109   : > { %905 = vrot.lane.b32.xlu0 %v530_v43, %s3143_s28 }
 0x10a   : > { %v1128_v59 = vpop.permute.xlu1 %1127 }
 0x10b   : > { %v1050_v0 = vpop.permute.xlu0 %1049  ;;  %v1330_v1 = vsel %vm1325_vm10, %v1309_v45, %v1128_v59  ;;  %v533_v59 = vld [vmem:[#allocation2 + $0xda] sm:$0xff] }
 0x10c   : > { %747 = vrot.lane.b32.xlu1 %v3591_v53, %s3141_s26  ;;  %2973 = vmatprep.mubr.msk.f32.mxu0 %vm1351_vm11, %v1330_v1  ;;  %v1310_v30 = vsel %vm1304_vm9, %v1289_v2, %v1050_v0  ;;  %v514_v0 = vld [vmem:[#allocation2 + $0xe1] sm:$0xff] }
 0x10d   : > { %669 = vrot.lane.b32.xlu0 %v530_v43, %s3139_s19 }
 0x10e   : > { %v814_v13 = vpop.permute.xlu1 %813 }
 0x10f   : > { %v3618_v15 = vpop.permute.xlu0 %575  ;;  %v1249_v50 = vsel %vm1241_vm6, %v1228_v55, %v814_v13  ;;  %v478_v55 = vld [vmem:[#allocation2 + $0xfa] sm:$0xff] }
 0x110   : > { %1063 = vrot.lane.b32.xlu1 %v511_v7, %s3145_s13 }
 0x111   : > { %985 = vrot.lane.b32.xlu0 %v3614_v8, %s3144_s8 }
 0x112   : > { %v1130_v5 = vpop.permute.xlu1 %1129 }
 0x113   : > { %v892_v11 = vpop.permute.xlu0 %891  ;;  %v1331_v14 = vsel %vm1325_vm10, %v1310_v30, %v1130_v5  ;;  %v1187_v30 = vsel %vm276_vm1, %v3403_v54, %v3618_v15 }
 0x114   : > { %827 = vrot.lane.b32.xlu1 %v511_v7, %s3142_s27  ;;  %2974 = vmatmul.mubr.msk.f32.gmra.mrb[4].mxu0 %vm1351_vm11, %v1331_v14  ;;  %v1269_v40 = vsel %vm1262_vm7, %v1248_v39, %v892_v11  ;;  %v495_v11 = vld [vmem:[#allocation2 + $0xf0] sm:$0xff] }
 0x115   : > { %749 = vrot.lane.b32.xlu0 %v3614_v8, %s3141_s26 }
 0x116   : > { %v3632_v16 = vpop.permute.xlu1 %655 }
 0x117   : > { %v3634_v20 = vpop.permute.xlu0 %577  ;;  %v1208_v5 = vsel %vm1199_vm4, %v1187_v30, %v3632_v16  ;;  %v537_v30 = vld [vmem:[#allocation2 + $0x10a] sm:$0xff] }
 0x118   : > { %1143 = vrot.lane.b32.xlu1 %v531_v18, %s3146_s17 }
 0x119   : > { %1065 = vrot.lane.b32.xlu0 %v512_v19, %s3145_s13 }
 0x11a   : > { %v972_v21 = vpop.permute.xlu1 %971 }
 0x11b   : > { %v894_v22 = vpop.permute.xlu0 %893  ;;  %v1290_v48 = vsel %vm1283_vm8, %v1269_v40, %v972_v21 }
 0x11c   : > { %829 = vrot.lane.b32.xlu1 %v512_v19, %s3142_s27  ;;  %v1270_v38 = vsel %vm1262_vm7, %v1249_v50, %v894_v22 }
 0x11d   : > { %591 = vrot.lane.b32.xlu0 %v511_v7, %s3140_s25 }
 0x11e   : > { %v3640_v27 = vpop.permute.xlu1 %735 }
 0x11f   : > { %v3642_v29 = vpop.permute.xlu0 %657  ;;  %v1229_v14 = vsel %vm1220_vm5, %v1208_v5, %v3640_v27  ;;  %v1188_v27 = vsel %vm276_vm1, %v3411_v56, %v3634_v20 }
 0x120   : > { %1145 = vrot.lane.b32.xlu1 %v532_v25, %s3146_s17 }
 0x121   : > { %907 = vrot.lane.b32.xlu0 %v531_v18, %s3143_s28 }
 0x122   : > { %v1052_v12 = vpop.permute.xlu1 %1051 }
 0x123   : > { %v974_v17 = vpop.permute.xlu0 %973  ;;  %v1311_v28 = vsel %vm1304_vm9, %v1290_v48, %v1052_v12 }
 0x124   : > { %671 = vrot.lane.b32.xlu1 %v531_v18, %s3139_s19  ;;  %v1291_v46 = vsel %vm1283_vm8, %v1270_v38, %v974_v17  ;;  %v1209_v17 = vsel %vm1199_vm4, %v1188_v27, %v3642_v29  ;;  %v498_v38 = vld [vmem:[#allocation2 + $0x110] sm:$0xff] }
 0x125   : > { %593 = vrot.lane.b32.xlu0 %v512_v19, %s3140_s25 }
 0x126   : > { %v816_v35 = vpop.permute.xlu1 %815 }
 0x127   : > { %v3657_v36 = vpop.permute.xlu0 %737  ;;  %v1250_v21 = vsel %vm1241_vm6, %v1229_v14, %v816_v35 }
 0x128   : > { %987 = vrot.lane.b32.xlu1 %v3653_v33, %s3144_s8  ;;  %v1230_v26 = vsel %vm1220_vm5, %v1209_v17, %v3657_v36  ;;  %v535_v36 = vld [vmem:[#allocation2 + $0xf2] sm:$0xff] }
 0x129   : > { %909 = vrot.lane.b32.xlu0 %v532_v25, %s3143_s28 }
 0x12a   : > { %v1132_v37 = vpop.permute.xlu1 %1131 }
 0x12b   : > { %v1054_v43 = vpop.permute.xlu0 %1053  ;;  %v1332_v44 = vsel %vm1325_vm10, %v1311_v28, %v1132_v37 }
 0x12c   : > { %751 = vrot.lane.b32.xlu1 %v3653_v33, %s3141_s26  ;;  %2976 = vmatprep.mubr.msk.f32.mxu0 %vm1351_vm11, %v1332_v44  ;;  %v1312_v63 = vsel %vm1304_vm9, %v1291_v46, %v1054_v43  ;;  %v516_v43 = vld [vmem:[#allocation2 + $0xf9] sm:$0xff]  ;;  %v497_v46 = vld [vmem:[#allocation2 + $0x108] sm:$0xff] }
 0x12d   : > { %673 = vrot.lane.b32.xlu0 %v532_v25, %s3139_s19 }
 0x12e   : > { %v818_v57 = vpop.permute.xlu1 %817 }
 0x12f   : > { %v3680_v61 = vpop.permute.xlu0 %579  ;;  %v1251_v40 = vsel %vm1241_vm6, %v1230_v26, %v818_v57 }
 0x130   : > { %1067 = vrot.lane.b32.xlu1 %v513_v51, %s3145_s13 }
 0x131   : > { %989 = vrot.lane.b32.xlu0 %v3676_v52, %s3144_s8 }
 0x132   : > { %v1134_v34 = vpop.permute.xlu1 %1133 }
 0x133   : > { %v896_v45 = vpop.permute.xlu0 %895  ;;  %v1333_v58 = vsel %vm1325_vm10, %v1312_v63, %v1134_v34 }
 0x134   : > { %831 = vrot.lane.b32.xlu1 %v513_v51, %s3142_s27  ;;  %2977 = vmatmul.mubr.msk.f32.gmra.mrb[6].mxu0 %vm1351_vm11, %v1333_v58  ;;  %v1271_v22 = vsel %vm1262_vm7, %v1250_v21, %v896_v45  ;;  %v1189_v45 = vsel %vm276_vm1, %v3427_v62, %v3680_v61  ;;  %v538_v61 = vld [vmem:[#allocation2 + $0x112] sm:$0xff] }
 0x135   : > { %753 = vrot.lane.b32.xlu0 %v3676_v52, %s3141_s26 }
 0x136   : > { %v3694_v1 = vpop.permute.xlu1 %659 }
 0x137   : > { %v3696_v3 = vpop.permute.xlu0 %581  ;;  %v1210_v58 = vsel %vm1199_vm4, %v1189_v45, %v3694_v1 }
 0x138   : > { %1147 = vrot.lane.b32.xlu1 %v533_v59, %s3146_s17  ;;  %v1190_v14 = vsel %vm276_vm1, %v3439_v4, %v3696_v3 }
 0x139   : > { %1069 = vrot.lane.b32.xlu0 %v514_v0, %s3145_s13 }
 0x13a   : > { %v976_v6 = vpop.permute.xlu1 %975 }
 0x13b   : > { %v898_v7 = vpop.permute.xlu0 %897  ;;  %v1292_v54 = vsel %vm1283_vm8, %v1271_v22, %v976_v6 }
 0x13c   : > { %833 = vrot.lane.b32.xlu1 %v514_v0, %s3142_s27  ;;  %v1272_v56 = vsel %vm1262_vm7, %v1251_v40, %v898_v7 }
 0x13d   : > { %595 = vrot.lane.b32.xlu0 %v513_v51, %s3140_s25 }
 0x13e   : > { %v3702_v13 = vpop.permute.xlu1 %739 }
 0x13f   : > { %v3704_v42 = vpop.permute.xlu0 %661  ;;  %v1231_v6 = vsel %vm1220_vm5, %v1210_v58, %v3702_v13 }
 0x140   : > { %1149 = vrot.lane.b32.xlu1 %v534_v10, %s3146_s17 }
 0x141   : > { %911 = vrot.lane.b32.xlu0 %v533_v59, %s3143_s28 }
 0x142   : > { %v1056_v60 = vpop.permute.xlu1 %1055 }
 0x143   : > { %v978_v2 = vpop.permute.xlu0 %977  ;;  %v1313_v15 = vsel %vm1304_vm9, %v1292_v54, %v1056_v60 }
 0x144   : > { %675 = vrot.lane.b32.xlu1 %v533_v59, %s3139_s19  ;;  %v1293_v20 = vsel %vm1283_vm8, %v1272_v56, %v978_v2  ;;  %v518_v59 = vld [vmem:[#allocation2 + $0x111] sm:$0xff] }
 0x145   : > { %597 = vrot.lane.b32.xlu0 %v514_v0, %s3140_s25  ;;  %v517_v0 = vld [vmem:[#allocation2 + $0x109] sm:$0xff] }
 0x146   : > { %v820_v18 = vpop.permute.xlu1 %819 }
 0x147   : > { %v3717_v19 = vpop.permute.xlu0 %741  ;;  %v1252_v60 = vsel %vm1241_vm6, %v1231_v6, %v820_v18  ;;  %v1211_v18 = vsel %vm1199_vm4, %v1190_v14, %v3704_v42 }
 0x148   : > { %991 = vrot.lane.b32.xlu1 %v495_v11, %s3144_s8  ;;  %v1232_v21 = vsel %vm1220_vm5, %v1211_v18, %v3717_v19 }
 0x149   : > { %913 = vrot.lane.b32.xlu0 %v534_v10, %s3143_s28 }
 0x14a   : > { %v1136_v16 = vpop.permute.xlu1 %1135 }
 0x14b   : > { %v1058_v25 = vpop.permute.xlu0 %1057  ;;  %v1334_v12 = vsel %vm1325_vm10, %v1313_v15, %v1136_v16 }
 0x14c   : > { %755 = vrot.lane.b32.xlu1 %v495_v11, %s3141_s26  ;;  %2979 = vmatprep.mubr.msk.f32.mxu0 %vm1351_vm11, %v1334_v12  ;;  %v1314_v29 = vsel %vm1304_vm9, %v1293_v20, %v1058_v25 }
 0x14d   : > { %677 = vrot.lane.b32.xlu0 %v534_v10, %s3139_s19 }
 0x14e   : > { %v822_v35 = vpop.permute.xlu1 %821 }
 0x14f   : > { %v3736_v39 = vpop.permute.xlu0 %583  ;;  %v1253_v15 = vsel %vm1241_vm6, %v1232_v21, %v822_v35 }
 0x150   : > { %1071 = vrot.lane.b32.xlu1 %v515_v31, %s3145_s13  ;;  %v1191_v56 = vsel %vm276_vm1, %v3467_v23, %v3736_v39 }
 0x151   : > { %993 = vrot.lane.b32.xlu0 %v496_v32, %s3144_s8 }
 0x152   : > { %v1138_v48 = vpop.permute.xlu1 %1137 }
 0x153   : > { %v900_v28 = vpop.permute.xlu0 %899  ;;  %v1335_v37 = vsel %vm1325_vm10, %v1314_v29, %v1138_v48 }
 0x154   : > { %835 = vrot.lane.b32.xlu1 %v515_v31, %s3142_s27  ;;  %2980 = vmatmul.mubr.msk.f32.gmra.mrb[8].mxu0 %vm1351_vm11, %v1335_v37  ;;  %v1273_v2 = vsel %vm1262_vm7, %v1252_v60, %v900_v28 }
 0x155   : > { %757 = vrot.lane.b32.xlu0 %v496_v32, %s3141_s26 }
 0x156   : > { %v3748_v44 = vpop.permute.xlu1 %663 }
 0x157   : > { %v3750_v47 = vpop.permute.xlu0 %585  ;;  %v1212_v20 = vsel %vm1199_vm4, %v1191_v56, %v3748_v44 }
 0x158   : > { %1151 = vrot.lane.b32.xlu1 %v535_v36, %s3146_s17  ;;  %v1192_v23 = vsel %vm276_vm1, %v3489_v41, %v3750_v47 }
 0x159   : > { %1073 = vrot.lane.b32.xlu0 %v516_v43, %s3145_s13 }
 0x15a   : > { %v980_v49 = vpop.permute.xlu1 %979 }
 0x15b   : > { %v902_v51 = vpop.permute.xlu0 %901  ;;  %v1294_v62 = vsel %vm1283_vm8, %v1273_v2, %v980_v49 }
 0x15c   : > { %915 = vrot.lane.b32.xlu1 %v535_v36, %s3143_s28  ;;  %v1274_v16 = vsel %vm1262_vm7, %v1253_v15, %v902_v51 }
 0x15d   : > { %837 = vrot.lane.b32.xlu0 %v516_v43, %s3142_s27 }
 0x15e   : > { %v744_v57 = vpop.permute.xlu1 %743 }
 0x15f   : > { %v3756_v50 = vpop.permute.xlu0 %665  ;;  %v1233_v29 = vsel %vm1220_vm5, %v1212_v20, %v744_v57 }
 0x160   : > { %917 = vrot.lane.b32.xlu1 %v478_v55, %s3143_s28  ;;  %v1213_v39 = vsel %vm1199_vm4, %v1192_v23, %v3756_v50 }
 0x161   : > { %1153 = vrot.lane.b32.xlu0 %v478_v55, %s3146_s17 }
 0x162   : > { %v1060_v63 = vpop.permute.xlu1 %1059 }
 0x163   : > { %v982_v34 = vpop.permute.xlu0 %981  ;;  %v1315_v1 = vsel %vm1304_vm9, %v1294_v62, %v1060_v63 }
 0x164   : > { %997 = vrot.lane.b32.xlu1 %v498_v38, %s3144_s8  ;;  %v1295_v4 = vsel %vm1283_vm8, %v1274_v16, %v982_v34 }
 0x165   : > { %995 = vrot.lane.b32.xlu0 %v497_v46, %s3144_s8 }
 0x166   : > { %v824_v7 = vpop.permute.xlu1 %823 }
 0x167   : > { %v746_v10 = vpop.permute.xlu0 %745  ;;  %v1254_v37 = vsel %vm1241_vm6, %v1233_v29, %v824_v7 }
 0x168   : > { %1077 = vrot.lane.b32.xlu1 %v518_v59, %s3145_s13  ;;  %v1234_v44 = vsel %vm1220_vm5, %v1213_v39, %v746_v10 }
 0x169   : > { %1075 = vrot.lane.b32.xlu0 %v517_v0, %s3145_s13 }
 0x16a   : > { %v1140_v5 = vpop.permute.xlu1 %1139 }
 0x16b   : > { %v1062_v11 = vpop.permute.xlu0 %1061  ;;  %v1336_v13 = vsel %vm1325_vm10, %v1315_v1, %v1140_v5 }
 0x16c   : > { %1157 = vrot.lane.b32.xlu1 %v538_v61, %s3146_s17  ;;  %2982 = vmatprep.mubr.msk.f32.mxu0 %vm1351_vm11, %v1336_v13  ;;  %v1316_v3 = vsel %vm1304_vm9, %v1295_v4, %v1062_v11  ;;  %v3831_v13 = vld [vmem:[%s4473_s2] ss:$0 sm:$0xff] }
 0x16d   : > { %1155 = vrot.lane.b32.xlu0 %v537_v30, %s3146_s17 }
 0x16e   : > { %v826_v22 = vpop.permute.xlu1 %825 }
 0x16f   : > { %v588_v54 = vpop.permute.xlu0 %587  ;;  %v1255_v63 = vsel %vm1241_vm6, %v1234_v44, %v826_v22 }
 0x170   : > { %v1193_v61 = vsel %vm276_vm1, %v3528_v9, %v588_v54  ;;  %v3838_v9 = vld [vmem:[%s4475_s4] ss:$0 sm:$0xff] }
 0x172   : > { %v1142_v25 = vpop.permute.xlu1 %1141 }
 0x173   : > { %v904_v12 = vpop.permute.xlu0 %903  ;;  %v1337_v27 = vsel %vm1325_vm10, %v1316_v3, %v1142_v25 }
 0x174   : > { %2983 = vmatmul.mubr.msk.f32.gmra.mrb[10].mxu0 %vm1351_vm11, %v1337_v27  ;;  %v1275_v36 = vsel %vm1262_vm7, %v1254_v37, %v904_v12 }
 0x176   : > { %v668_v42 = vpop.permute.xlu1 %667 }
 0x177   : > { %v590_v17 = vpop.permute.xlu0 %589  ;;  %v1214_v30 = vsel %vm1199_vm4, %v1193_v61, %v668_v42 }
 0x178   : > { %v1194_v42 = vsel %vm276_vm1, %v3552_v24, %v590_v17 }
 0x17a   : > { %v984_v31 = vpop.permute.xlu1 %983 }
 0x17b   : > { %v906_v19 = vpop.permute.xlu0 %905  ;;  %v1296_v43 = vsel %vm1283_vm8, %v1275_v36, %v984_v31 }
 0x17c   : > { %v1276_v34 = vsel %vm1262_vm7, %v1255_v63, %v906_v19 }
 0x17e   : > { %v748_v32 = vpop.permute.xlu1 %747 }
 0x17f   : > { %v670_v26 = vpop.permute.xlu0 %669  ;;  %v1235_v1 = vsel %vm1220_vm5, %v1214_v30, %v748_v32 }
 0x180   : > { %v1215_v19 = vsel %vm1199_vm4, %v1194_v42, %v670_v26 }
 0x182   : > { %v1064_v40 = vpop.permute.xlu1 %1063 }
 0x183   : > { %v986_v35 = vpop.permute.xlu0 %985  ;;  %v1317_v49 = vsel %vm1304_vm9, %v1296_v43, %v1064_v40 }
 0x184   : > { %v1297_v45 = vsel %vm1283_vm8, %v1276_v34, %v986_v35 }
 0x186   : > { %v828_v48 = vpop.permute.xlu1 %827 }
 0x187   : > { %v750_v28 = vpop.permute.xlu0 %749  ;;  %v1256_v14 = vsel %vm1241_vm6, %v1235_v1, %v828_v48 }
 0x188   : > { %v1236_v40 = vsel %vm1220_vm5, %v1215_v19, %v750_v28 }
 0x18a   : > { %v1144_v51 = vpop.permute.xlu1 %1143 }
 0x18b   : > { %v1066_v55 = vpop.permute.xlu0 %1065  ;;  %v1338_v38 = vsel %vm1325_vm10, %v1317_v49, %v1144_v51 }
 0x18c   : > { %2985 = vmatprep.mubr.msk.f32.mxu0 %vm1351_vm11, %v1338_v38  ;;  %v1318_v58 = vsel %vm1304_vm9, %v1297_v45, %v1066_v55 }
 0x18e   : > { %v830_v57 = vpop.permute.xlu1 %829 }
 0x18f   : > { %v3810_v46 = vpop.permute.xlu0 %591  ;;  %v1257_v29 = vsel %vm1241_vm6, %v1236_v40, %v830_v57 }
 0x190   : > { %v1195_v44 = vsel %vm276_vm1, %v3591_v53, %v3810_v46 }
 0x192   : > { %v1146_v59 = vpop.permute.xlu1 %1145 }
 0x193   : > { %v908_v41 = vpop.permute.xlu0 %907  ;;  %v1339_v47 = vsel %vm1325_vm10, %v1318_v58, %v1146_v59 }
 0x194   : > { %2986 = vmatmul.mubr.msk.f32.gmra.mrb[12].mxu0 %vm1351_vm11, %v1339_v47  ;;  %v1277_v18 = vsel %vm1262_vm7, %v1256_v14, %v908_v41 }
 0x196   : > { %v672_v50 = vpop.permute.xlu1 %671 }
 0x197   : > { %v3818_v0 = vpop.permute.xlu0 %593  ;;  %v1216_v57 = vsel %vm1199_vm4, %v1195_v44, %v672_v50 }
 0x198   : > { %v1196_v61 = vsel %vm276_vm1, %v3614_v8, %v3818_v0 }
 0x19a   : > { %v988_v6 = vpop.permute.xlu1 %987 }
 0x19b   : > { %v910_v7 = vpop.permute.xlu0 %909  ;;  %v1298_v22 = vsel %vm1283_vm8, %v1277_v18, %v988_v6 }
 0x19c   : > { %v1278_v48 = vsel %vm1262_vm7, %v1257_v29, %v910_v7 }
 0x19e   : > { %v752_v10 = vpop.permute.xlu1 %751 }
 0x19f   : > { %v3820_v60 = vpop.permute.xlu0 %673  ;;  %v1237_v63 = vsel %vm1220_vm5, %v1216_v57, %v752_v10 }
 0x1a0   : > { %v1217_v1 = vsel %vm1199_vm4, %v1196_v61, %v3820_v60 }
 0x1a2   : > { %v1068_v2 = vpop.permute.xlu1 %1067 }
 0x1a3   : > { %v990_v62 = vpop.permute.xlu0 %989  ;;  %v1319_v16 = vsel %vm1304_vm9, %v1298_v22, %v1068_v2 }
 0x1a4   : > { %v1299_v24 = vsel %vm1283_vm8, %v1278_v48, %v990_v62 }
 0x1a6   : > { %v832_v5 = vpop.permute.xlu1 %831 }
 0x1a7   : > { %v3826_v11 = vpop.permute.xlu0 %753  ;;  %v2969_v21 = vpop.f32.mrb[0].mxu0  ;;  %v1258_v58 = vsel %vm1241_vm6, %v1237_v63, %v832_v5 }
 0x1a8   : > { %v1588_v54 = vmul.f32 %v2969_v21, %v3831_v13  ;;  %v1482_v15 = vpop.f32.mrb[1].mxu0  ;;  %v1238_v14 = vsel %vm1220_vm5, %v1217_v1, %v3826_v11 }
 0x1a9   : > { %v1587_v4 = vmul.f32 %v3831_v13, %v1482_v15 }
 0x1aa   : > { %v1148_v3 = vpop.permute.xlu1 %1147  ;;  %v1614_v12 = vadd.f32 %v3838_v9, %v1588_v54 }
 0x1ab   : > { %v1070_v25 = vpop.permute.xlu0 %1069  ;;  %v1340_v27 = vsel %vm1325_vm10, %v1319_v16, %v1148_v3  ;;  %v1613_v31 = vadd.f32 %v3838_v9, %v1587_v4 }
 0x1ac   : > { %2988 = vmatprep.mubr.msk.f32.mxu0 %vm1351_vm11, %v1340_v27  ;;  %v1634_v32 = vmax.f32 %v1614_v12, 0.0  ;;  %v1320_v17 = vsel %vm1304_vm9, %v1299_v24, %v1070_v25 }
 0x1ad   : > { %v1633_v35 = vmax.f32 %v1613_v31, 0.0 }
 0x1ae   : > { %v834_v56 = vpop.permute.xlu1 %833  ;;  %1654 = vst.msk [vmem:[#allocation2 + $0x9] sm:$0xff] %vm276_vm1, %v1634_v32 }
 0x1af   : > { %v596_v20 = vpop.permute.xlu0 %595  ;;  %1653 = vst.msk [vmem:[#allocation2 + $0x1] sm:$0xff] %vm276_vm1, %v1633_v35  ;;  %v1259_v54 = vsel %vm1241_vm6, %v1238_v14, %v834_v56 }
 0x1b0   : > { %v1197_v25 = vsel %vm276_vm1, %v3653_v33, %v596_v20 }
 0x1b2   : > { %v1150_v37 = vpop.permute.xlu1 %1149 }
 0x1b3   : > { %v912_v26 = vpop.permute.xlu0 %911  ;;  %v1341_v36 = vsel %vm1325_vm10, %v1320_v17, %v1150_v37 }
 0x1b4   : > { %2989 = vmatmul.mubr.msk.f32.gmra.mrb[14].mxu0 %vm1351_vm11, %v1341_v36  ;;  %v1279_v59 = vsel %vm1262_vm7, %v1258_v58, %v912_v26 }
 0x1b6   : > { %v676_v28 = vpop.permute.xlu1 %675 }
 0x1b7   : > { %v598_v43 = vpop.permute.xlu0 %597  ;;  %v1218_v27 = vsel %vm1199_vm4, %v1197_v25, %v676_v28 }
 0x1b8   : > { %v1198_v12 = vsel %vm276_vm1, %v3676_v52, %v598_v43 }
 0x1ba   : > { %v992_v49 = vpop.permute.xlu1 %991 }
 0x1bb   : > { %v914_v51 = vpop.permute.xlu0 %913  ;;  %v1300_v47 = vsel %vm1283_vm8, %v1279_v59, %v992_v49 }
 0x1bc   : > { %v1280_v8 = vsel %vm1262_vm7, %v1259_v54, %v914_v51 }
 0x1be   : > { %v756_v55 = vpop.permute.xlu1 %755 }
 0x1bf   : > { %v678_v38 = vpop.permute.xlu0 %677  ;;  %v1239_v31 = vsel %vm1220_vm5, %v1218_v27, %v756_v55 }
 0x1c0   : > { %v1219_v42 = vsel %vm1199_vm4, %v1198_v12, %v678_v38 }
 0x1c2   : > { %v1072_v23 = vpop.permute.xlu1 %1071 }
 0x1c3   : > { %v994_v39 = vpop.permute.xlu0 %993  ;;  %v1321_v2 = vsel %vm1304_vm9, %v1300_v47, %v1072_v23 }
 0x1c4   : > { %v1301_v0 = vsel %vm1283_vm8, %v1280_v8, %v994_v39 }
 0x1c6   : > { %v836_v34 = vpop.permute.xlu1 %835 }
 0x1c7   : > { %v758_v45 = vpop.permute.xlu0 %757  ;;  %v2972_v41 = vpop.f32.mrb[2].mxu0  ;;  %v1260_v35 = vsel %vm1241_vm6, %v1239_v31, %v836_v34 }
 0x1c8   : > { %v1590_v6 = vmul.f32 %v2972_v41, %v3831_v13  ;;  %v1492_v7 = vpop.f32.mrb[3].mxu0  ;;  %v1240_v19 = vsel %vm1220_vm5, %v1219_v42, %v758_v45 }
 0x1c9   : > { %v1589_v53 = vmul.f32 %v3831_v13, %v1492_v7 }
 0x1ca   : > { %v1152_v46 = vpop.permute.xlu1 %1151  ;;  %v1616_v10 = vadd.f32 %v3838_v9, %v1590_v6 }
 0x1cb   : > { %v1074_v50 = vpop.permute.xlu0 %1073  ;;  %v1342_v62 = vsel %vm1325_vm10, %v1321_v2, %v1152_v46  ;;  %v1615_v30 = vadd.f32 %v3838_v9, %v1589_v53 }
 0x1cc   : > { %2991 = vmatprep.mubr.msk.f32.mxu0 %vm1351_vm11, %v1342_v62  ;;  %v1636_v5 = vmax.f32 %v1616_v10, 0.0  ;;  %v1322_v15 = vsel %vm1304_vm9, %v1301_v0, %v1074_v50 }
 0x1cd   : > { %v1635_v18 = vmax.f32 %v1615_v30, 0.0 }
 0x1ce   : > { %v916_v21 = vpop.permute.xlu1 %915  ;;  %1656 = vst.msk [vmem:[#allocation2 + $0x21] sm:$0xff] %vm276_vm1, %v1636_v5 }
 0x1cf   : > { %v838_v22 = vpop.permute.xlu0 %837  ;;  %1655 = vst.msk [vmem:[#allocation2 + $0x19] sm:$0xff] %vm276_vm1, %v1635_v18  ;;  %v1281_v29 = vsel %vm1262_vm7, %v1260_v35, %v916_v21 }
 0x1d0   : > { %v1261_v56 = vsel %vm1241_vm6, %v1240_v19, %v838_v22 }
 0x1d2   : > { %v918_v60 = vpop.permute.xlu1 %917 }
 0x1d3   : > { %v1154_v16 = vpop.permute.xlu0 %1153  ;;  %v1282_v33 = vsel %vm1262_vm7, %v1261_v56, %v918_v60 }
 0x1d4   : > { %v1343_v4 = vsel %vm1325_vm10, %v1322_v15, %v1154_v16 }
 0x1d5   : > { %2992 = vmatmul.mubr.msk.f32.gmra.mrb[16].mxu0 %vm1351_vm11, %v1343_v4 }
 0x1d6   : > { %v998_v11 = vpop.permute.xlu1 %997 }
 0x1d7   : > { %v996_v3 = vpop.permute.xlu0 %995  ;;  %v1303_v52 = vsel %vm1283_vm8, %v1282_v33, %v998_v11 }
 0x1d8   : > { %v1302_v20 = vsel %vm1283_vm8, %v1281_v29, %v996_v3 }
 0x1da   : > { %v1078_v32 = vpop.permute.xlu1 %1077 }
 0x1db   : > { %v1076_v40 = vpop.permute.xlu0 %1075  ;;  %v1324_v48 = vsel %vm1304_vm9, %v1303_v52, %v1078_v32 }
 0x1dc   : > { %v1323_v24 = vsel %vm1304_vm9, %v1302_v20, %v1076_v40 }
 0x1de   : > { %v1158_v17 = vpop.permute.xlu1 %1157 }
 0x1df   : > { %v1156_v37 = vpop.permute.xlu0 %1155  ;;  %v1345_v26 = vsel %vm1325_vm10, %v1324_v48, %v1158_v17 }
 0x1e0   : > { %v1344_v36 = vsel %vm1325_vm10, %v1323_v24, %v1156_v37 }
 0x1e1   : > { %2994 = vmatprep.mubr.msk.f32.mxu0 %vm1351_vm11, %v1344_v36 }
 0x1e2   : > { %2995 = vmatmul.mubr.msk.f32.gmra.mrb[18].mxu0 %vm1351_vm11, %v1345_v26 }
 0x1e7   : > { %v2975_v28 = vpop.f32.mrb[4].mxu0 }
 0x1e8   : > { %v1592_v43 = vmul.f32 %v2975_v28, %v3831_v13  ;;  %v1502_v49 = vpop.f32.mrb[5].mxu0 }
 0x1e9   : > { %v1591_v51 = vmul.f32 %v3831_v13, %v1502_v49  ;;  %v3147_v49 = vmov (!%p2886_p9), 0.0  }
 0x1ea   : > { %v1618_v55 = vadd.f32 %v3838_v9, %v1592_v43  ;;  %1677 = vst.msk [vmem:[#allocation2 + $0x1] sm:$0xff] (!%p2886_p9), %vm276_vm1, %v3147_v49  ;;  %1678 = vst.msk [vmem:[#allocation2 + $0x9] sm:$0xff] (!%p2886_p9), %vm276_vm1, %v3147_v49 }
 0x1eb   : > { %v1617_v38 = vadd.f32 %v3838_v9, %v1591_v51 }
 0x1ec   : > { %v1638_v23 = vmax.f32 %v1618_v55, 0.0 }
 0x1ed   : > { %v1637_v39 = vmax.f32 %v1617_v38, 0.0 }
 0x1ee   : > { %1658 = vst.msk [vmem:[#allocation2 + $0x39] sm:$0xff] %vm276_vm1, %v1638_v23 }
 0x1ef   : > { %1657 = vst.msk [vmem:[#allocation2 + $0x31] sm:$0xff] %vm276_vm1, %v1637_v39 }
 0x207   : > { %v2978_v44 = vpop.f32.mrb[6].mxu0 }
 0x208   : > { %v1594_v57 = vmul.f32 %v2978_v44, %v3831_v13  ;;  %v1512_v63 = vpop.f32.mrb[7].mxu0 }
 0x209   : > { %v1593_v34 = vmul.f32 %v3831_v13, %v1512_v63 }
 0x20a   : > { %v1620_v45 = vadd.f32 %v3838_v9, %v1594_v57 }
 0x20b   : > { %v1619_v58 = vadd.f32 %v3838_v9, %v1593_v34 }
 0x20c   : > { %v1640_v59 = vmax.f32 %v1620_v45, 0.0 }
 0x20d   : > { %v1639_v41 = vmax.f32 %v1619_v58, 0.0 }
 0x20e   : > { %1660 = vst.msk [vmem:[#allocation2 + $0x51] sm:$0xff] %vm276_vm1, %v1640_v59 }
 0x20f   : > { %1659 = vst.msk [vmem:[#allocation2 + $0x49] sm:$0xff] %vm276_vm1, %v1639_v41 }
 0x227   : > { %v2981_v47 = vpop.f32.mrb[8].mxu0 }
 0x228   : > { %v1596_v6 = vmul.f32 %v2981_v47, %v3831_v13  ;;  %v1522_v7 = vpop.f32.mrb[9].mxu0 }
 0x229   : > { %v1595_v2 = vmul.f32 %v3831_v13, %v1522_v7 }
 0x22a   : > { %v1622_v53 = vadd.f32 %v3838_v9, %v1596_v6 }
 0x22b   : > { %v1621_v46 = vadd.f32 %v3838_v9, %v1595_v2 }
 0x22c   : > { %v1642_v50 = vmax.f32 %v1622_v53, 0.0 }
 0x22d   : > { %v1641_v10 = vmax.f32 %v1621_v46, 0.0 }
 0x22e   : > { %1662 = vst.msk [vmem:[#allocation2 + $0x69] sm:$0xff] %vm276_vm1, %v1642_v50 }
 0x22f   : > { %1661 = vst.msk [vmem:[#allocation2 + $0x61] sm:$0xff] %vm276_vm1, %v1641_v10 }
 0x247   : > { %v2984_v62 = vpop.f32.mrb[10].mxu0 }
 0x248   : > { %v1598_v61 = vmul.f32 %v2984_v62, %v3831_v13  ;;  %v1532_v30 = vpop.f32.mrb[11].mxu0 }
 0x249   : > { %v1597_v1 = vmul.f32 %v3831_v13, %v1532_v30 }
 0x24a   : > { %v1624_v5 = vadd.f32 %v3838_v9, %v1598_v61 }
 0x24b   : > { %v1623_v14 = vadd.f32 %v3838_v9, %v1597_v1 }
 0x24c   : > { %v1644_v18 = vmax.f32 %v1624_v5, 0.0 }
 0x24d   : > { %v1643_v21 = vmax.f32 %v1623_v14, 0.0 }
 0x24e   : > { %1664 = vst.msk [vmem:[#allocation2 + $0x81] sm:$0xff] %vm276_vm1, %v1644_v18 }
 0x24f   : > { %1663 = vst.msk [vmem:[#allocation2 + $0x79] sm:$0xff] %vm276_vm1, %v1643_v21 }
 0x267   : > { %v2987_v22 = vpop.f32.mrb[12].mxu0 }
 0x268   : > { %v1600_v54 = vmul.f32 %v2987_v22, %v3831_v13  ;;  %v1542_v8 = vpop.f32.mrb[13].mxu0 }
 0x269   : > { %v1599_v0 = vmul.f32 %v3831_v13, %v1542_v8 }
 0x26a   : > { %v1626_v15 = vadd.f32 %v3838_v9, %v1600_v54 }
 0x26b   : > { %v1625_v60 = vadd.f32 %v3838_v9, %v1599_v0 }
 0x26c   : > { %v1646_v16 = vmax.f32 %v1626_v15, 0.0 }
 0x26d   : > { %v1645_v4 = vmax.f32 %v1625_v60, 0.0 }
 0x26e   : > { %1666 = vst.msk [vmem:[#allocation2 + $0x99] sm:$0xff] %vm276_vm1, %v1646_v16 }
 0x26f   : > { %1665 = vst.msk [vmem:[#allocation2 + $0x91] sm:$0xff] %vm276_vm1, %v1645_v4 }
 0x287   : > { %v2990_v11 = vpop.f32.mrb[14].mxu0 }
 0x288   : > { %v1602_v3 = vmul.f32 %v2990_v11, %v3831_v13  ;;  %v1552_v25 = vpop.f32.mrb[15].mxu0 }
 0x289   : > { %v1601_v12 = vmul.f32 %v3831_v13, %v1552_v25 }
 0x28a   : > { %v1628_v27 = vadd.f32 %v3838_v9, %v1602_v3 }
 0x28b   : > { %v1627_v42 = vadd.f32 %v3838_v9, %v1601_v12 }
 0x28c   : > { %v1648_v31 = vmax.f32 %v1628_v27, 0.0 }
 0x28d   : > { %v1647_v19 = vmax.f32 %v1627_v42, 0.0 }
 0x28e   : > { %1668 = vst.msk [vmem:[#allocation2 + $0xb1] sm:$0xff] %vm276_vm1, %v1648_v31 }
 0x28f   : > { %1667 = vst.msk [vmem:[#allocation2 + $0xa9] sm:$0xff] %vm276_vm1, %v1647_v19 }
 0x2a8   : > { %v2993_v32 = vpop.f32.mrb[16].mxu0 }
 0x2a9   : > { %v1604_v40 = vmul.f32 %v2993_v32, %v3831_v13  ;;  %v1562_v35 = vpop.f32.mrb[17].mxu0 }
 0x2aa   : > { %v1603_v56 = vmul.f32 %v3831_v13, %v1562_v35 }
 0x2ab   : > { %v1630_v29 = vadd.f32 %v3838_v9, %v1604_v40 }
 0x2ac   : > { %v1629_v33 = vadd.f32 %v3838_v9, %v1603_v56 }
 0x2ad   : > { %v1650_v52 = vmax.f32 %v1630_v29, 0.0 }
 0x2ae   : > { %v1649_v20 = vmax.f32 %v1629_v33, 0.0 }
 0x2af   : > { %1670 = vst.msk [vmem:[#allocation2 + $0xc9] sm:$0xff] %vm276_vm1, %v1650_v52 }
 0x2b0   : > { %1669 = vst.msk [vmem:[#allocation2 + $0xc1] sm:$0xff] %vm276_vm1, %v1649_v20 }
 0x2b5   : > { %v2996_v48 = vpop.f32.mrb[18].mxu0 }
 0x2b6   : > { %v1606_v24 = vmul.f32 %v2996_v48, %v3831_v13  ;;  %v1572_v17 = vpop.f32.mrb[19].mxu0 }
 0x2b7   : > { %v1605_v37 = vmul.f32 %v3831_v13, %v1572_v17  ;;  %1676 = sbr.rel (%p2886_p9) target bundleno = 702 (0x2be), region = 52 }
 0x2b8   : > { %v1632_v26 = vadd.f32 %v3838_v9, %v1606_v24 }
 0x2b9   : > { %v1631_v36 = vadd.f32 %v3838_v9, %v1605_v37 }
 0x2ba   : > { %v1652_v28 = vmax.f32 %v1632_v26, 0.0 }
 0x2bb   : > { %v1651_v43 = vmax.f32 %v1631_v36, 0.0 }
 0x2bc   : > { %1672 = vst.msk [vmem:[#allocation2 + $0xe1] sm:$0xff] %vm276_vm1, %v1652_v28 }
 0x2bd   : > { %1671 = vst.msk [vmem:[#allocation2 + $0xd9] sm:$0xff] %vm276_vm1, %v1651_v43 }
 0x2be PF: > { %p2887_p10 = scmp.ne.s32.totalorder %s3120_s18, 1 }
 0x2bf   : > { %v3148_v13 = vmov (!%p2887_p10), 0.0  }
 0x2c0   : > { %1682 = sbr.rel (%p2887_p10) target bundleno = 711 (0x2c7), region = 56  ;;  %1684 = vst.msk [vmem:[#allocation2 + $0xd9] sm:$0xff] (!%p2887_p10), %vm276_vm1, %v3148_v13  ;;  %1685 = vst.msk [vmem:[#allocation2 + $0xe1] sm:$0xff] (!%p2887_p10), %vm276_vm1, %v3148_v13 }
 0x2c7 PF: > { %v1719_v51 = vld [vmem:[#allocation2 + $0x2] sm:$0xff]  ;;  %v1720_v38 = vld [vmem:[#allocation2 + $0xa] sm:$0xff]  ;;  %v3970_v44 = vld [vmem:[#allocation2 + $0x18] sm:$0xff] }
 0x2c8   : > { %v1703_v55 = vld [vmem:[#allocation2 + $0x1] sm:$0xff]  ;;  %1911 = vrot.lane.b32.xlu1 %v1719_v51, %s3139_s19  ;;  %v1704_v23 = vld [vmem:[#allocation2 + $0x9] sm:$0xff]  ;;  %v1705_v57 = vld [vmem:[#allocation2 + $0x19] sm:$0xff] }
 0x2c9   : > { %1847 = vrot.lane.b32.xlu0 %v1703_v55, %s3140_s25  ;;  %v3968_v39 = vld [vmem:[#allocation2 + $0x20] sm:$0xff]  ;;  %v3982_v45 = vld [vmem:[#allocation2 + $0x30] sm:$0xff]  ;;  %v2472_v41 = vld [vmem:[%s4472_s1 + $0x8] sm:$0xff] }
 0x2ca   : > { %v1767_v63 = vld [vmem:[#allocation2 + $0x1a] sm:$0xff]  ;;  %v1768_v58 = vld [vmem:[#allocation2 + $0x22] sm:$0xff]  ;;  %v2473_v6 = vld [vmem:[%s4472_s1 + $0x10] sm:$0xff] }
 0x2cb   : > { %v1752_v34 = vld [vmem:[#allocation2 + $0x21] sm:$0xff]  ;;  %v2474_v7 = vld [vmem:[%s4472_s1 + $0x18] sm:$0xff]  ;;  %v1801_v1 = vld [vmem:[#allocation2 + $0x49] sm:$0xff] }
 0x2cc   : > { %1913 = vrot.lane.b32.xlu1 %v1720_v38, %s3139_s19  ;;  %v2471_v59 = vld [vmem:[%s4472_s1] sm:$0xff]  ;;  %v1799_v2 = vld [vmem:[#allocation2 + $0x31] sm:$0xff]  ;;  %v3043_v46 = vpack.c.bf16 %v2474_v7, %v2473_v6  ;;  %v4023_v30 = vld [vmem:[#allocation2 + $0x48] sm:$0xff] }
 0x2cd   : > { %1849 = vrot.lane.b32.xlu0 %v1704_v23, %s3140_s25  ;;  %v3039_v47 = vpack.c.bf16 %v2472_v41, %v2471_v59  ;;  %v4002_v53 = vld [vmem:[#allocation2 + $0x38] sm:$0xff]  ;;  %v2475_v50 = vld [vmem:[%s4472_s1 + $0x20] sm:$0xf]  ;;  %v4031_v5 = vld [vmem:[#allocation2 + $0x50] sm:$0xff] }
 0x2ce   : > { %v1815_v10 = vld [vmem:[#allocation2 + $0x32] sm:$0xff]  ;;  %v1816_v61 = vld [vmem:[#allocation2 + $0x3a] sm:$0xff]  ;;  %v1817_v14 = vld [vmem:[#allocation2 + $0x4a] sm:$0xff] }
 0x2cf   : > { %3040 = vmatprep.subr.bf16.mxu1 %v3039_v47  ;;  %v1800_v62 = vld [vmem:[#allocation2 + $0x39] sm:$0xff]  ;;  %v1802_v18 = vld [vmem:[#allocation2 + $0x51] sm:$0xff]  ;;  %v1803_v54 = vld [vmem:[#allocation2 + $0x61] sm:$0xff] }
 0x2d0   : > { %1977 = vrot.lane.b32.xlu1 %v3968_v39, %s3141_s26  ;;  %3042 = vmatpush3.bf16.msra.mxu1 %v3039_v47  ;;  %v1818_v21 = vld [vmem:[#allocation2 + $0x52] sm:$0xff]  ;;  %v4047_v22 = vld [vmem:[#allocation2 + $0x60] sm:$0xff]  ;;  %v4055_v8 = vld [vmem:[#allocation2 + $0x68] sm:$0xff] }
 0x2d1   : > { %1975 = vrot.lane.b32.xlu0 %v3970_v44, %s3141_s26  ;;  %3044 = vmatprep.subr.bf16.mxu1 %v3043_v46  ;;  %v1819_v0 = vld [vmem:[#allocation2 + $0x62] sm:$0xff]  ;;  %v1820_v60 = vld [vmem:[#allocation2 + $0x6a] sm:$0xff]  ;;  %v4071_v11 = vld [vmem:[#allocation2 + $0x78] sm:$0xff] }
 0x2d2   : > { %v1804_v15 = vld [vmem:[#allocation2 + $0x69] sm:$0xff]  ;;  %v1805_v42 = vld [vmem:[#allocation2 + $0x79] sm:$0xff]  ;;  %v1806_v29 = vld [vmem:[#allocation2 + $0x81] sm:$0xff] }
 0x2d3   : > { %v4079_v31 = vld [vmem:[#allocation2 + $0x80] sm:$0xff]  ;;  %v4107_v13 = vld [vmem:[#allocation2 + $0x90] sm:$0xff]  ;;  %v1688_v23 = vld [vmem:[#allocation2 + $0x8] sm:$0xff] }
 0x2d4   : > { %1851 = vrot.lane.b32.xlu1 %v1705_v57, %s3140_s25  ;;  %3046 = vmatpush3.bf16.msra.mxu1 %v3043_v46  ;;  %v1821_v56 = vld [vmem:[#allocation2 + $0x7a] sm:$0xff]  ;;  %v1822_v24 = vld [vmem:[#allocation2 + $0x82] sm:$0xff] }
 0x2d5   : > { %2039 = vrot.lane.b32.xlu0 %v1705_v57, %s3142_s27  ;;  %3005 = vmatprep.subr.msk.mxu1 %vm1412_vm3, %v2475_v50  ;;  %v1687_v26 = vld [vmem:[#allocation2] sm:$0xff]  ;;  %v4126_v46 = vld [vmem:[#allocation2 + $0x98] sm:$0xff] }
 0x2d8   : > { %2103 = vrot.lane.b32.xlu1 %v1767_v63, %s3143_s28  ;;  %3006 = vmatpush3.msk.msra.mxu1 %vm1412_vm3, %v2475_v50 }
 0x2d9   : > { %2041 = vrot.lane.b32.xlu0 %v1752_v34, %s3142_s27 }
 0x2dc   : > { %1915 = vrot.lane.b32.xlu1 %v1767_v63, %s3139_s19 }
 0x2dd   : > { %1853 = vrot.lane.b32.xlu0 %v1752_v34, %s3140_s25 }
 0x2e0   : > { %2167 = vrot.lane.b32.xlu1 %v3982_v45, %s3144_s8 }
 0x2e1   : > { %2105 = vrot.lane.b32.xlu0 %v1768_v58, %s3143_s28 }
 0x2e4   : > { %1979 = vrot.lane.b32.xlu1 %v3982_v45, %s3141_s26 }
 0x2e5   : > { %1917 = vrot.lane.b32.xlu0 %v1768_v58, %s3139_s19 }
 0x2e8   : > { %2231 = vrot.lane.b32.xlu1 %v1799_v2, %s3145_s13 }
 0x2e9   : > { %2169 = vrot.lane.b32.xlu0 %v4002_v53, %s3144_s8 }
 0x2ec   : > { %2043 = vrot.lane.b32.xlu1 %v1799_v2, %s3142_s27 }
 0x2ed   : > { %1981 = vrot.lane.b32.xlu0 %v4002_v53, %s3141_s26 }
 0x2f0   : > { %2295 = vrot.lane.b32.xlu1 %v1815_v10, %s3146_s17 }
 0x2f1   : > { %2233 = vrot.lane.b32.xlu0 %v1800_v62, %s3145_s13 }
 0x2f4   : > { %2045 = vrot.lane.b32.xlu1 %v1800_v62, %s3142_s27 }
 0x2f5   : > { %1855 = vrot.lane.b32.xlu0 %v1799_v2, %s3140_s25  ;;  %v1807_v2 = vld [vmem:[#allocation2 + $0x91] sm:$0xff] }
 0x2f8   : > { %2297 = vrot.lane.b32.xlu1 %v1816_v61, %s3146_s17 }
 0x2f9   : > { %2107 = vrot.lane.b32.xlu0 %v1815_v10, %s3143_s28 }
 0x2fc   : > { %1919 = vrot.lane.b32.xlu1 %v1815_v10, %s3139_s19 }
 0x2fd   : > { %1857 = vrot.lane.b32.xlu0 %v1800_v62, %s3140_s25 }
 0x300   : > { %2171 = vrot.lane.b32.xlu1 %v4023_v30, %s3144_s8 }
 0x301   : > { %2109 = vrot.lane.b32.xlu0 %v1816_v61, %s3143_s28 }
 0x304   : > { %1983 = vrot.lane.b32.xlu1 %v4023_v30, %s3141_s26 }
 0x305   : > { %1921 = vrot.lane.b32.xlu0 %v1816_v61, %s3139_s19 }
 0x308   : > { %2235 = vrot.lane.b32.xlu1 %v1801_v1, %s3145_s13 }
 0x309   : > { %2173 = vrot.lane.b32.xlu0 %v4031_v5, %s3144_s8 }
 0x30c   : > { %2047 = vrot.lane.b32.xlu1 %v1801_v1, %s3142_s27 }
 0x30d   : > { %1985 = vrot.lane.b32.xlu0 %v4031_v5, %s3141_s26 }
 0x310   : > { %2299 = vrot.lane.b32.xlu1 %v1817_v14, %s3146_s17 }
 0x311   : > { %2237 = vrot.lane.b32.xlu0 %v1802_v18, %s3145_s13 }
 0x314   : > { %2049 = vrot.lane.b32.xlu1 %v1802_v18, %s3142_s27 }
 0x315   : > { %1859 = vrot.lane.b32.xlu0 %v1801_v1, %s3140_s25 }
 0x318   : > { %2301 = vrot.lane.b32.xlu1 %v1818_v21, %s3146_s17 }
 0x319   : > { %2111 = vrot.lane.b32.xlu0 %v1817_v14, %s3143_s28 }
 0x31c   : > { %1923 = vrot.lane.b32.xlu1 %v1817_v14, %s3139_s19 }
 0x31d   : > { %1861 = vrot.lane.b32.xlu0 %v1802_v18, %s3140_s25 }
 0x320   : > { %2175 = vrot.lane.b32.xlu1 %v4047_v22, %s3144_s8 }
 0x321   : > { %2113 = vrot.lane.b32.xlu0 %v1818_v21, %s3143_s28 }
 0x324   : > { %1987 = vrot.lane.b32.xlu1 %v4047_v22, %s3141_s26 }
 0x325   : > { %1925 = vrot.lane.b32.xlu0 %v1818_v21, %s3139_s19 }
 0x328   : > { %2239 = vrot.lane.b32.xlu1 %v1803_v54, %s3145_s13 }
 0x329   : > { %2177 = vrot.lane.b32.xlu0 %v4055_v8, %s3144_s8 }
 0x32c   : > { %2051 = vrot.lane.b32.xlu1 %v1803_v54, %s3142_s27 }
 0x32d   : > { %1989 = vrot.lane.b32.xlu0 %v4055_v8, %s3141_s26 }
 0x330   : > { %2303 = vrot.lane.b32.xlu1 %v1819_v0, %s3146_s17 }
 0x331   : > { %2241 = vrot.lane.b32.xlu0 %v1804_v15, %s3145_s13 }
 0x334   : > { %2053 = vrot.lane.b32.xlu1 %v1804_v15, %s3142_s27 }
 0x335   : > { %1863 = vrot.lane.b32.xlu0 %v1803_v54, %s3140_s25 }
 0x338   : > { %2305 = vrot.lane.b32.xlu1 %v1820_v60, %s3146_s17 }
 0x339   : > { %2115 = vrot.lane.b32.xlu0 %v1819_v0, %s3143_s28 }
 0x33a   : > { %v1912_v16 = vpop.permute.xlu1 %1911 }
 0x33b   : > { %v1848_v4 = vpop.permute.xlu0 %1847 }
 0x33c   : > { %1927 = vrot.lane.b32.xlu1 %v1819_v0, %s3139_s19  ;;  %v2343_v36 = vsel %vm276_vm1, %v1687_v26, %v1848_v4 }
 0x33d   : > { %1865 = vrot.lane.b32.xlu0 %v1804_v15, %s3140_s25  ;;  %v2359_v49 = vsel %vm1199_vm4, %v2343_v36, %v1912_v16  ;;  %v1823_v15 = vld [vmem:[#allocation2 + $0x92] sm:$0xff] }
 0x33e   : > { %v1914_v3 = vpop.permute.xlu1 %1913 }
 0x33f   : > { %v1850_v25 = vpop.permute.xlu0 %1849 }
 0x340   : > { %2179 = vrot.lane.b32.xlu1 %v4071_v11, %s3144_s8  ;;  %v2344_v58 = vsel %vm276_vm1, %v1688_v23, %v1850_v25 }
 0x341   : > { %2117 = vrot.lane.b32.xlu0 %v1820_v60, %s3143_s28  ;;  %v2360_v7 = vsel %vm1199_vm4, %v2344_v58, %v1914_v3 }
 0x342   : > { %v1978_v12 = vpop.permute.xlu1 %1977 }
 0x343   : > { %v1976_v27 = vpop.permute.xlu0 %1975  ;;  %v2376_v50 = vsel %vm1220_vm5, %v2360_v7, %v1978_v12  ;;  %v1824_v12 = vld [vmem:[#allocation2 + $0x9a] sm:$0xff] }
 0x344   : > { %1991 = vrot.lane.b32.xlu1 %v4071_v11, %s3141_s26  ;;  %v2375_v51 = vsel %vm1220_vm5, %v2359_v49, %v1976_v27 }
 0x345   : > { %1929 = vrot.lane.b32.xlu0 %v1820_v60, %s3139_s19  ;;  %v1808_v60 = vld [vmem:[#allocation2 + $0x99] sm:$0xff] }
 0x346   : > { %v4081_v19 = vpop.permute.xlu1 %1851 }
 0x347   : > { %v2040_v32 = vpop.permute.xlu0 %2039 }
 0x348   : > { %2243 = vrot.lane.b32.xlu1 %v1805_v42, %s3145_s13  ;;  %v2391_v57 = vsel %vm1241_vm6, %v2375_v51, %v2040_v32  ;;  %v1809_v51 = vld [vmem:[#allocation2 + $0xa9] sm:$0xff] }
 0x349   : > { %2181 = vrot.lane.b32.xlu0 %v4079_v31, %s3144_s8 }
 0x34a   : > { %v2104_v40 = vpop.permute.xlu1 %2103 }
 0x34b   : > { %v2042_v35 = vpop.permute.xlu0 %2041  ;;  %v2407_v63 = vsel %vm1262_vm7, %v2391_v57, %v2104_v40 }
 0x34c   : > { %2055 = vrot.lane.b32.xlu1 %v1805_v42, %s3142_s27  ;;  %v2392_v61 = vsel %vm1241_vm6, %v2376_v50, %v2042_v35  ;;  %v2345_v35 = vsel %vm276_vm1, %v3970_v44, %v4081_v19 }
 0x34d   : > { %1993 = vrot.lane.b32.xlu0 %v4079_v31, %s3141_s26 }
 0x34e   : > { %v4089_v33 = vpop.permute.xlu1 %1915 }
 0x34f   : > { %v4091_v52 = vpop.permute.xlu0 %1853 }
 0x350   : > { %2307 = vrot.lane.b32.xlu1 %v1821_v56, %s3146_s17 }
 0x351   : > { %2245 = vrot.lane.b32.xlu0 %v1806_v29, %s3145_s13 }
 0x352   : > { %v2168_v20 = vpop.permute.xlu1 %2167 }
 0x353   : > { %v2106_v48 = vpop.permute.xlu0 %2105  ;;  %v2423_v34 = vsel %vm1283_vm8, %v2407_v63, %v2168_v20 }
 0x354   : > { %2057 = vrot.lane.b32.xlu1 %v1806_v29, %s3142_s27  ;;  %v2408_v1 = vsel %vm1262_vm7, %v2392_v61, %v2106_v48 }
 0x355   : > { %1867 = vrot.lane.b32.xlu0 %v1805_v42, %s3140_s25 }
 0x356   : > { %v4097_v17 = vpop.permute.xlu1 %1979 }
 0x357   : > { %v4099_v37 = vpop.permute.xlu0 %1917 }
 0x358   : > { %2309 = vrot.lane.b32.xlu1 %v1822_v24, %s3146_s17 }
 0x359   : > { %2119 = vrot.lane.b32.xlu0 %v1821_v56, %s3143_s28 }
 0x35a   : > { %v2232_v28 = vpop.permute.xlu1 %2231 }
 0x35b   : > { %v2170_v43 = vpop.permute.xlu0 %2169  ;;  %v2439_v47 = vsel %vm1304_vm9, %v2423_v34, %v2232_v28 }
 0x35c   : > { %1931 = vrot.lane.b32.xlu1 %v1821_v56, %s3139_s19  ;;  %v2424_v14 = vsel %vm1283_vm8, %v2408_v1, %v2170_v43  ;;  %v2361_v56 = vsel %vm1199_vm4, %v2345_v35, %v4089_v33  ;;  %v2346_v43 = vsel %vm276_vm1, %v3968_v39, %v4091_v52 }
 0x35d   : > { %1869 = vrot.lane.b32.xlu0 %v1806_v29, %s3140_s25  ;;  %v4164_v29 = vld [vmem:[#allocation2 + $0xa8] sm:$0xff]  ;;  %v2377_v20 = vsel %vm1220_vm5, %v2361_v56, %v4097_v17  ;;  %v2362_v49 = vsel %vm1199_vm4, %v2346_v43, %v4099_v37 }
 0x35e   : > { %v2044_v55 = vpop.permute.xlu1 %2043  ;;  %v1811_v56 = vld [vmem:[#allocation2 + $0xc1] sm:$0xff] }
 0x35f   : > { %v4110_v38 = vpop.permute.xlu0 %1981  ;;  %v2393_v26 = vsel %vm1241_vm6, %v2377_v20, %v2044_v55  ;;  %v4187_v55 = vld [vmem:[#allocation2 + $0xb0] sm:$0xff]  ;;  %v1796_v20 = vld [vmem:[#allocation2 + $0xc8] sm:$0xff] }
 0x360   : > { %2183 = vrot.lane.b32.xlu1 %v4107_v13, %s3144_s8  ;;  %v2378_v23 = vsel %vm1220_vm5, %v2362_v49, %v4110_v38 }
 0x361   : > { %2121 = vrot.lane.b32.xlu0 %v1822_v24, %s3143_s28 }
 0x362   : > { %v2296_v59 = vpop.permute.xlu1 %2295 }
 0x363   : > { %v2234_v41 = vpop.permute.xlu0 %2233  ;;  %v2455_v6 = vsel %vm1325_vm10, %v2439_v47, %v2296_v59  ;;  %v1810_v47 = vld [vmem:[#allocation2 + $0xb1] sm:$0xff] }
 0x364   : > { %1995 = vrot.lane.b32.xlu1 %v4107_v13, %s3141_s26  ;;  %3007 = vmatprep.mubr.msk.f32.mxu1 %vm1351_vm11, %v2455_v6  ;;  %v2440_v18 = vsel %vm1304_vm9, %v2424_v14, %v2234_v41  ;;  %v1825_v41 = vld [vmem:[#allocation2 + $0xaa] sm:$0xff] }
 0x365   : > { %1933 = vrot.lane.b32.xlu0 %v1822_v24, %s3139_s19 }
 0x366   : > { %v2046_v10 = vpop.permute.xlu1 %2045 }
 0x367   : > { %v4129_v62 = vpop.permute.xlu0 %1855  ;;  %v2394_v39 = vsel %vm1241_vm6, %v2378_v23, %v2046_v10  ;;  %v1826_v10 = vld [vmem:[#allocation2 + $0xb2] sm:$0xff] }
 0x368   : > { %2247 = vrot.lane.b32.xlu1 %v1807_v2, %s3145_s13 }
 0x369   : > { %2185 = vrot.lane.b32.xlu0 %v4126_v46, %s3144_s8 }
 0x36a   : > { %v2298_v21 = vpop.permute.xlu1 %2297 }
 0x36b   : > { %v2108_v54 = vpop.permute.xlu0 %2107  ;;  %v2456_v0 = vsel %vm1325_vm10, %v2440_v18, %v2298_v21  ;;  %v2347_v21 = vsel %vm276_vm1, %v3982_v45, %v4129_v62 }
 0x36c   : > { %2059 = vrot.lane.b32.xlu1 %v1807_v2, %s3142_s27  ;;  %3008 = vmatmul.mubr.msk.f32.vlgmr.msra.gmra.mrb[0].mxu1 %vm1351_vm11, %v2456_v0  ;;  %v2409_v36 = vsel %vm1262_vm7, %v2393_v26, %v2108_v54  ;;  %v1795_v0 = vld [vmem:[#allocation2 + $0xc0] sm:$0xff] }
 0x36d   : > { %1997 = vrot.lane.b32.xlu0 %v4126_v46, %s3141_s26 }
 0x36e   : > { %v4143_v16 = vpop.permute.xlu1 %1919 }
 0x36f   : > { %v4145_v4 = vpop.permute.xlu0 %1857  ;;  %v2363_v54 = vsel %vm1199_vm4, %v2347_v21, %v4143_v16 }
 0x370   : > { %2311 = vrot.lane.b32.xlu1 %v1823_v15, %s3146_s17 }
 0x371   : > { %2249 = vrot.lane.b32.xlu0 %v1808_v60, %s3145_s13 }
 0x372   : > { %v2172_v3 = vpop.permute.xlu1 %2171 }
 0x373   : > { %v2110_v25 = vpop.permute.xlu0 %2109  ;;  %v2425_v44 = vsel %vm1283_vm8, %v2409_v36, %v2172_v3 }
 0x374   : > { %2061 = vrot.lane.b32.xlu1 %v1808_v60, %s3142_s27  ;;  %v2410_v52 = vsel %vm1262_vm7, %v2394_v39, %v2110_v25 }
 0x375   : > { %1871 = vrot.lane.b32.xlu0 %v1807_v2, %s3140_s25 }
 0x376   : > { %v4151_v27 = vpop.permute.xlu1 %1983 }
 0x377   : > { %v4153_v42 = vpop.permute.xlu0 %1921 }
 0x378   : > { %2313 = vrot.lane.b32.xlu1 %v1824_v12, %s3146_s17 }
 0x379   : > { %2123 = vrot.lane.b32.xlu0 %v1823_v15, %s3143_s28 }
 0x37a   : > { %v2236_v32 = vpop.permute.xlu1 %2235 }
 0x37b   : > { %v2174_v40 = vpop.permute.xlu0 %2173  ;;  %v2441_v19 = vsel %vm1304_vm9, %v2425_v44, %v2236_v32 }
 0x37c   : > { %1935 = vrot.lane.b32.xlu1 %v1823_v15, %s3139_s19  ;;  %v2426_v37 = vsel %vm1283_vm8, %v2410_v52, %v2174_v40  ;;  %v2379_v15 = vsel %vm1220_vm5, %v2363_v54, %v4151_v27  ;;  %v2348_v27 = vsel %vm276_vm1, %v4002_v53, %v4145_v4  ;;  %v1829_v54 = vld [vmem:[#allocation2 + $0xda] sm:$0xff] }
 0x37d   : > { %1873 = vrot.lane.b32.xlu0 %v1808_v60, %s3140_s25  ;;  %v2364_v35 = vsel %vm1199_vm4, %v2348_v27, %v4153_v42 }
 0x37e   : > { %v2048_v48 = vpop.permute.xlu1 %2047 }
 0x37f   : > { %v4168_v24 = vpop.permute.xlu0 %1985  ;;  %v2395_v25 = vsel %vm1241_vm6, %v2379_v15, %v2048_v48 }
 0x380   : > { %2187 = vrot.lane.b32.xlu1 %v4164_v29, %s3144_s8  ;;  %v2380_v48 = vsel %vm1220_vm5, %v2364_v35, %v4168_v24  ;;  %v1827_v24 = vld [vmem:[#allocation2 + $0xc2] sm:$0xff] }
 0x381   : > { %2125 = vrot.lane.b32.xlu0 %v1824_v12, %s3143_s28 }
 0x382   : > { %v2300_v33 = vpop.permute.xlu1 %2299 }
 0x383   : > { %v2238_v28 = vpop.permute.xlu0 %2237  ;;  %v2457_v17 = vsel %vm1325_vm10, %v2441_v19, %v2300_v33 }
 0x384   : > { %1999 = vrot.lane.b32.xlu1 %v4164_v29, %s3141_s26  ;;  %3010 = vmatprep.mubr.msk.f32.mxu1 %vm1351_vm11, %v2457_v17  ;;  %v2442_v34 = vsel %vm1304_vm9, %v2426_v37, %v2238_v28  ;;  %v1812_v17 = vld [vmem:[#allocation2 + $0xc9] sm:$0xff]  ;;  %v1798_v37 = vld [vmem:[#allocation2 + $0xe0] sm:$0xff] }
 0x385   : > { %1937 = vrot.lane.b32.xlu0 %v1824_v12, %s3139_s19 }
 0x386   : > { %v2050_v57 = vpop.permute.xlu1 %2049 }
 0x387   : > { %v4191_v63 = vpop.permute.xlu0 %1859  ;;  %v2396_v44 = vsel %vm1241_vm6, %v2380_v48, %v2050_v57  ;;  %v1782_v57 = vld [vmem:[#allocation2 + $0xca] sm:$0xff] }
 0x388   : > { %2251 = vrot.lane.b32.xlu1 %v1809_v51, %s3145_s13 }
 0x389   : > { %2189 = vrot.lane.b32.xlu0 %v4187_v55, %s3144_s8 }
 0x38a   : > { %v2302_v58 = vpop.permute.xlu1 %2301 }
 0x38b   : > { %v2112_v59 = vpop.permute.xlu0 %2111  ;;  %v2458_v38 = vsel %vm1325_vm10, %v2442_v34, %v2302_v58  ;;  %v1797_v34 = vld [vmem:[#allocation2 + $0xd8] sm:$0xff] }
 0x38c   : > { %2063 = vrot.lane.b32.xlu1 %v1809_v51, %s3142_s27  ;;  %3011 = vmatmul.mubr.msk.f32.gmra.mrb[2].mxu1 %vm1351_vm11, %v2458_v38  ;;  %v2411_v12 = vsel %vm1262_vm7, %v2395_v25, %v2112_v59  ;;  %v2349_v38 = vsel %vm276_vm1, %v4023_v30, %v4191_v63  ;;  %v1830_v63 = vld [vmem:[#allocation2 + $0xe2] sm:$0xff] }
 0x38d   : > { %2001 = vrot.lane.b32.xlu0 %v4187_v55, %s3141_s26 }
 0x38e   : > { %v4205_v6 = vpop.permute.xlu1 %1923 }
 0x38f   : > { %v4207_v7 = vpop.permute.xlu0 %1861 }
 0x390   : > { %2315 = vrot.lane.b32.xlu1 %v1825_v41, %s3146_s17 }
 0x391   : > { %2253 = vrot.lane.b32.xlu0 %v1810_v47, %s3145_s13 }
 0x392   : > { %v2176_v2 = vpop.permute.xlu1 %2175 }
 0x393   : > { %v2114_v50 = vpop.permute.xlu0 %2113  ;;  %v2427_v45 = vsel %vm1283_vm8, %v2411_v12, %v2176_v2  ;;  %v1813_v2 = vld [vmem:[#allocation2 + $0xd9] sm:$0xff] }
 0x394   : > { %2065 = vrot.lane.b32.xlu1 %v1810_v47, %s3142_s27  ;;  %v2412_v53 = vsel %vm1262_vm7, %v2396_v44, %v2114_v50 }
 0x395   : > { %1875 = vrot.lane.b32.xlu0 %v1809_v51, %s3140_s25 }
 0x396   : > { %v4213_v61 = vpop.permute.xlu1 %1987 }
 0x397   : > { %v4215_v1 = vpop.permute.xlu0 %1925 }
 0x398   : > { %2317 = vrot.lane.b32.xlu1 %v1826_v10, %s3146_s17 }
 0x399   : > { %2127 = vrot.lane.b32.xlu0 %v1825_v41, %s3143_s28 }
 0x39a   : > { %v2240_v14 = vpop.permute.xlu1 %2239 }
 0x39b   : > { %v2178_v18 = vpop.permute.xlu0 %2177  ;;  %v2443_v62 = vsel %vm1304_vm9, %v2427_v45, %v2240_v14 }
 0x39c   : > { %1939 = vrot.lane.b32.xlu1 %v1825_v41, %s3139_s19  ;;  %v2428_v4 = vsel %vm1283_vm8, %v2412_v53, %v2178_v18  ;;  %v2365_v41 = vsel %vm1199_vm4, %v2349_v38, %v4205_v6 }
 0x39d   : > { %1877 = vrot.lane.b32.xlu0 %v1810_v47, %s3140_s25  ;;  %v1814_v47 = vld [vmem:[#allocation2 + $0xe1] sm:$0xff]  ;;  %v2381_v50 = vsel %vm1220_vm5, %v2365_v41, %v4213_v61 }
 0x39e   : > { %v2052_v60 = vpop.permute.xlu1 %2051 }
 0x39f   : > { %v4228_v3 = vpop.permute.xlu0 %1989  ;;  %v2397_v18 = vsel %vm1241_vm6, %v2381_v50, %v2052_v60  ;;  %v2350_v60 = vsel %vm276_vm1, %v4031_v5, %v4207_v7 }
 0x3a0   : > { %2191 = vrot.lane.b32.xlu1 %v1795_v0, %s3144_s8  ;;  %v2366_v25 = vsel %vm1199_vm4, %v2350_v60, %v4215_v1 }
 0x3a1   : > { %2129 = vrot.lane.b32.xlu0 %v1826_v10, %s3143_s28  ;;  %v2382_v12 = vsel %vm1220_vm5, %v2366_v25, %v4228_v3 }
 0x3a2   : > { %v2304_v16 = vpop.permute.xlu1 %2303 }
 0x3a3   : > { %v2242_v32 = vpop.permute.xlu0 %2241  ;;  %v2459_v40 = vsel %vm1325_vm10, %v2443_v62, %v2304_v16 }
 0x3a4   : > { %2003 = vrot.lane.b32.xlu1 %v1795_v0, %s3141_s26  ;;  %3013 = vmatprep.mubr.msk.f32.mxu1 %vm1351_vm11, %v2459_v40  ;;  %v2444_v42 = vsel %vm1304_vm9, %v2428_v4, %v2242_v32 }
 0x3a5   : > { %1941 = vrot.lane.b32.xlu0 %v1826_v10, %s3139_s19 }
 0x3a6   : > { %v2054_v26 = vpop.permute.xlu1 %2053 }
 0x3a7   : > { %v4247_v36 = vpop.permute.xlu0 %1863  ;;  %v2398_v16 = vsel %vm1241_vm6, %v2382_v12, %v2054_v26 }
 0x3a8   : > { %2255 = vrot.lane.b32.xlu1 %v1811_v56, %s3145_s13  ;;  %v2351_v4 = vsel %vm276_vm1, %v4047_v22, %v4247_v36 }
 0x3a9   : > { %2193 = vrot.lane.b32.xlu0 %v1796_v20, %s3144_s8 }
 0x3aa   : > { %v2306_v19 = vpop.permute.xlu1 %2305 }
 0x3ab   : > { %v2116_v33 = vpop.permute.xlu0 %2115  ;;  %v2460_v28 = vsel %vm1325_vm10, %v2444_v42, %v2306_v19 }
 0x3ac   : > { %2067 = vrot.lane.b32.xlu1 %v1811_v56, %s3142_s27  ;;  %3014 = vmatmul.mubr.msk.f32.gmra.mrb[4].mxu1 %vm1351_vm11, %v2460_v28  ;;  %v2413_v21 = vsel %vm1262_vm7, %v2397_v18, %v2116_v33 }
 0x3ad   : > { %2005 = vrot.lane.b32.xlu0 %v1796_v20, %s3141_s26 }
 0x3ae   : > { %v4259_v43 = vpop.permute.xlu1 %1927 }
 0x3af   : > { %v4261_v49 = vpop.permute.xlu0 %1865  ;;  %v2367_v42 = vsel %vm1199_vm4, %v2351_v4, %v4259_v43 }
 0x3b0   : > { %2319 = vrot.lane.b32.xlu1 %v1827_v24, %s3146_s17  ;;  %v2352_v22 = vsel %vm276_vm1, %v4055_v8, %v4261_v49 }
 0x3b1   : > { %2257 = vrot.lane.b32.xlu0 %v1812_v17, %s3145_s13 }
 0x3b2   : > { %v2180_v51 = vpop.permute.xlu1 %2179 }
 0x3b3   : > { %v2118_v23 = vpop.permute.xlu0 %2117  ;;  %v2429_v30 = vsel %vm1283_vm8, %v2413_v21, %v2180_v51 }
 0x3b4   : > { %2131 = vrot.lane.b32.xlu1 %v1827_v24, %s3143_s28  ;;  %v2414_v32 = vsel %vm1262_vm7, %v2398_v16, %v2118_v23 }
 0x3b5   : > { %2069 = vrot.lane.b32.xlu0 %v1812_v17, %s3142_s27 }
 0x3b6   : > { %v1992_v39 = vpop.permute.xlu1 %1991 }
 0x3b7   : > { %v4267_v52 = vpop.permute.xlu0 %1929  ;;  %v2383_v19 = vsel %vm1220_vm5, %v2367_v42, %v1992_v39 }
 0x3b8   : > { %2133 = vrot.lane.b32.xlu1 %v1782_v57, %s3143_s28  ;;  %v2368_v36 = vsel %vm1199_vm4, %v2352_v22, %v4267_v52 }
 0x3b9   : > { %2321 = vrot.lane.b32.xlu0 %v1782_v57, %s3146_s17 }
 0x3ba   : > { %v2244_v58 = vpop.permute.xlu1 %2243 }
 0x3bb   : > { %v2182_v59 = vpop.permute.xlu0 %2181  ;;  %v2445_v6 = vsel %vm1304_vm9, %v2429_v30, %v2244_v58 }
 0x3bc   : > { %2197 = vrot.lane.b32.xlu1 %v1798_v37, %s3144_s8  ;;  %v2430_v5 = vsel %vm1283_vm8, %v2414_v32, %v2182_v59 }
 0x3bd   : > { %2195 = vrot.lane.b32.xlu0 %v1797_v34, %s3144_s8 }
 0x3be   : > { %v2056_v10 = vpop.permute.xlu1 %2055 }
 0x3bf   : > { %v1994_v14 = vpop.permute.xlu0 %1993  ;;  %v2399_v24 = vsel %vm1241_vm6, %v2383_v19, %v2056_v10 }
 0x3c0   : > { %2261 = vrot.lane.b32.xlu1 %v1814_v47, %s3145_s13  ;;  %v2384_v43 = vsel %vm1220_vm5, %v2368_v36, %v1994_v14 }
 0x3c1   : > { %2259 = vrot.lane.b32.xlu0 %v1813_v2, %s3145_s13 }
 0x3c2   : > { %v2308_v0 = vpop.permute.xlu1 %2307 }
 0x3c3   : > { %v2246_v15 = vpop.permute.xlu0 %2245  ;;  %v2461_v61 = vsel %vm1325_vm10, %v2445_v6, %v2308_v0 }
 0x3c4   : > { %2325 = vrot.lane.b32.xlu1 %v1830_v63, %s3146_s17  ;;  %3016 = vmatprep.mubr.msk.f32.mxu1 %vm1351_vm11, %v2461_v61  ;;  %v2446_v7 = vsel %vm1304_vm9, %v2430_v5, %v2246_v15 }
 0x3c5   : > { %2323 = vrot.lane.b32.xlu0 %v1829_v54, %s3146_s17 }
 0x3c6   : > { %v2058_v45 = vpop.permute.xlu1 %2057 }
 0x3c7   : > { %v1868_v62 = vpop.permute.xlu0 %1867  ;;  %v2400_v59 = vsel %vm1241_vm6, %v2384_v43, %v2058_v45 }
 0x3c8   : > { %v2353_v54 = vsel %vm276_vm1, %v4071_v11, %v1868_v62 }
 0x3ca   : > { %v2310_v40 = vpop.permute.xlu1 %2309 }
 0x3cb   : > { %v2120_v27 = vpop.permute.xlu0 %2119  ;;  %v2462_v35 = vsel %vm1325_vm10, %v2446_v7, %v2310_v40 }
 0x3cc   : > { %3017 = vmatmul.mubr.msk.f32.gmra.mrb[6].mxu1 %vm1351_vm11, %v2462_v35  ;;  %v2415_v17 = vsel %vm1262_vm7, %v2399_v24, %v2120_v27 }
 0x3ce   : > { %v1932_v1 = vpop.permute.xlu1 %1931 }
 0x3cf   : > { %v1870_v56 = vpop.permute.xlu0 %1869  ;;  %v2369_v6 = vsel %vm1199_vm4, %v2353_v54, %v1932_v1 }
 0x3d0   : > { %v2354_v11 = vsel %vm276_vm1, %v4079_v31, %v1870_v56 }
 0x3d2   : > { %v2184_v20 = vpop.permute.xlu1 %2183 }
 0x3d3   : > { %v2122_v3 = vpop.permute.xlu0 %2121  ;;  %v2431_v51 = vsel %vm1283_vm8, %v2415_v17, %v2184_v20 }
 0x3d4   : > { %v2416_v38 = vsel %vm1262_vm7, %v2400_v59, %v2122_v3 }
 0x3d6   : > { %v1996_v48 = vpop.permute.xlu1 %1995 }
 0x3d7   : > { %v1934_v44 = vpop.permute.xlu0 %1933  ;;  %v2385_v0 = vsel %vm1220_vm5, %v2369_v6, %v1996_v48 }
 0x3d8   : > { %v2370_v62 = vsel %vm1199_vm4, %v2354_v11, %v1934_v44 }
 0x3da   : > { %v2248_v53 = vpop.permute.xlu1 %2247 }
 0x3db   : > { %v2186_v26 = vpop.permute.xlu0 %2185  ;;  %v2447_v23 = vsel %vm1304_vm9, %v2431_v51, %v2248_v53 }
 0x3dc   : > { %v2432_v41 = vsel %vm1283_vm8, %v2416_v38, %v2186_v26 }
 0x3de   : > { %v2060_v33 = vpop.permute.xlu1 %2059 }
 0x3df   : > { %v1998_v28 = vpop.permute.xlu0 %1997  ;;  %v2401_v60 = vsel %vm1241_vm6, %v2385_v0, %v2060_v33 }
 0x3e0   : > { %v2386_v7 = vsel %vm1220_vm5, %v2370_v62, %v1998_v28 }
 0x3e2   : > { %v2312_v57 = vpop.permute.xlu1 %2311 }
 0x3e3   : > { %v2250_v37 = vpop.permute.xlu0 %2249  ;;  %v2463_v34 = vsel %vm1325_vm10, %v2447_v23, %v2312_v57 }
 0x3e4   : > { %3019 = vmatprep.mubr.msk.f32.mxu1 %vm1351_vm11, %v2463_v34  ;;  %v2448_v47 = vsel %vm1304_vm9, %v2432_v41, %v2250_v37 }
 0x3e6   : > { %v2062_v39 = vpop.permute.xlu1 %2061 }
 0x3e7   : > { %v1872_v58 = vpop.permute.xlu0 %1871  ;;  %v2402_v35 = vsel %vm1241_vm6, %v2386_v7, %v2062_v39 }
 0x3e8   : > { %v2355_v24 = vsel %vm276_vm1, %v4107_v13, %v1872_v58 }
 0x3ea   : > { %v2314_v2 = vpop.permute.xlu1 %2313 }
 0x3eb   : > { %v2124_v50 = vpop.permute.xlu0 %2123  ;;  %v2464_v8 = vsel %vm1325_vm10, %v2448_v47, %v2314_v2 }
 0x3ec   : > { %3020 = vmatmul.mubr.msk.f32.gmra.mrb[8].mxu1 %vm1351_vm11, %v2464_v8  ;;  %v2417_v25 = vsel %vm1262_vm7, %v2401_v60, %v2124_v50 }
 0x3ee   : > { %v1936_v49 = vpop.permute.xlu1 %1935 }
 0x3ef   : > { %v1874_v52 = vpop.permute.xlu0 %1873  ;;  %v2371_v17 = vsel %vm1199_vm4, %v2355_v24, %v1936_v49 }
 0x3f0   : > { %v2356_v13 = vsel %vm276_vm1, %v4126_v46, %v1874_v52 }
 0x3f2   : > { %v2188_v10 = vpop.permute.xlu1 %2187 }
 0x3f3   : > { %v2126_v14 = vpop.permute.xlu0 %2125  ;;  %v2433_v12 = vsel %vm1283_vm8, %v2417_v25, %v2188_v10 }
 0x3f4   : > { %v2418_v1 = vsel %vm1262_vm7, %v2402_v35, %v2126_v14 }
 0x3f6   : > { %v2000_v18 = vpop.permute.xlu1 %1999 }
 0x3f7   : > { %v1938_v21 = vpop.permute.xlu0 %1937  ;;  %v2387_v51 = vsel %vm1220_vm5, %v2371_v17, %v2000_v18 }
 0x3f8   : > { %v2372_v58 = vsel %vm1199_vm4, %v2356_v13, %v1938_v21 }
 0x3fa   : > { %v2252_v30 = vpop.permute.xlu1 %2251 }
 0x3fb   : > { %v2190_v63 = vpop.permute.xlu0 %2189  ;;  %v2449_v45 = vsel %vm1304_vm9, %v2433_v12, %v2252_v30 }
 0x3fc   : > { %v2434_v20 = vsel %vm1283_vm8, %v2418_v1, %v2190_v63 }
 0x3fe   : > { %v2064_v15 = vpop.permute.xlu1 %2063 }
 0x3ff   : > { %v2002_v61 = vpop.permute.xlu0 %2001  ;;  %v2403_v37 = vsel %vm1241_vm6, %v2387_v51, %v2064_v15 }
 0x400   : > { %v2388_v38 = vsel %vm1220_vm5, %v2372_v58, %v2002_v61 }
 0x402   : > { %v2316_v16 = vpop.permute.xlu1 %2315 }
 0x403   : > { %v2254_v32 = vpop.permute.xlu0 %2253  ;;  %v2465_v5 = vsel %vm1325_vm10, %v2449_v45, %v2316_v16 }
 0x404   : > { %3022 = vmatprep.mubr.msk.f32.mxu1 %vm1351_vm11, %v2465_v5  ;;  %v2450_v3 = vsel %vm1304_vm9, %v2434_v20, %v2254_v32 }
 0x406   : > { %v2066_v40 = vpop.permute.xlu1 %2065 }
 0x407   : > { %v1876_v27 = vpop.permute.xlu0 %1875  ;;  %v2404_v2 = vsel %vm1241_vm6, %v2388_v38, %v2066_v40  ;;  %v4390_v40 = vld [vmem:[%s4474_s3] ss:$0 sm:$0xff] }
 0x408   : > { %v2357_v21 = vsel %vm276_vm1, %v4164_v29, %v1876_v27 }
 0x40a   : > { %v2318_v48 = vpop.permute.xlu1 %2317 }
 0x40b   : > { %v2128_v53 = vpop.permute.xlu0 %2127  ;;  %v2466_v31 = vsel %vm1325_vm10, %v2450_v3, %v2318_v48 }
 0x40c   : > { %3023 = vmatmul.mubr.msk.f32.gmra.mrb[10].mxu1 %vm1351_vm11, %v2466_v31  ;;  %v2419_v34 = vsel %vm1262_vm7, %v2403_v37, %v2128_v53 }
 0x40e   : > { %v1940_v56 = vpop.permute.xlu1 %1939 }
 0x40f   : > { %v1878_v44 = vpop.permute.xlu0 %1877  ;;  %v2373_v63 = vsel %vm1199_vm4, %v2357_v21, %v1940_v56 }
 0x410   : > { %v2358_v30 = vsel %vm276_vm1, %v4187_v55, %v1878_v44 }
 0x412   : > { %v2192_v26 = vpop.permute.xlu1 %2191 }
 0x413   : > { %v2130_v4 = vpop.permute.xlu0 %2129  ;;  %v2435_v22 = vsel %vm1283_vm8, %v2419_v34, %v2192_v26 }
 0x414   : > { %v2420_v50 = vsel %vm1262_vm7, %v2404_v2, %v2130_v4 }
 0x416   : > { %v2004_v42 = vpop.permute.xlu1 %2003 }
 0x417   : > { %v1942_v19 = vpop.permute.xlu0 %1941  ;;  %v2389_v6 = vsel %vm1220_vm5, %v2373_v63, %v2004_v42 }
 0x418   : > { %v2374_v54 = vsel %vm1199_vm4, %v2358_v30, %v1942_v19 }
 0x41a   : > { %v2256_v33 = vpop.permute.xlu1 %2255 }
 0x41b   : > { %v2194_v28 = vpop.permute.xlu0 %2193  ;;  %v2451_v36 = vsel %vm1304_vm9, %v2435_v22, %v2256_v33 }
 0x41c   : > { %v2436_v8 = vsel %vm1283_vm8, %v2420_v50, %v2194_v28 }
 0x41e   : > { %v2068_v23 = vpop.permute.xlu1 %2067 }
 0x41f   : > { %v2006_v57 = vpop.permute.xlu0 %2005  ;;  %v2405_v60 = vsel %vm1241_vm6, %v2389_v6, %v2068_v23 }
 0x420   : > { %v2390_v0 = vsel %vm1220_vm5, %v2374_v54, %v2006_v57 }
 0x422   : > { %v2320_v43 = vpop.permute.xlu1 %2319 }
 0x423   : > { %v2258_v39 = vpop.permute.xlu0 %2257  ;;  %v2467_v59 = vsel %vm1325_vm10, %v2451_v36, %v2320_v43 }
 0x424   : > { %3025 = vmatprep.mubr.msk.f32.mxu1 %vm1351_vm11, %v2467_v59  ;;  %v2452_v49 = vsel %vm1304_vm9, %v2436_v8, %v2258_v39 }
 0x426   : > { %v2132_v41 = vpop.permute.xlu1 %2131 }
 0x427   : > { %v2070_v47 = vpop.permute.xlu0 %2069  ;;  %v2421_v12 = vsel %vm1262_vm7, %v2405_v60, %v2132_v41 }
 0x428   : > { %v2406_v25 = vsel %vm1241_vm6, %v2390_v0, %v2070_v47 }
 0x42a   : > { %v2134_v10 = vpop.permute.xlu1 %2133 }
 0x42b   : > { %v2322_v14 = vpop.permute.xlu0 %2321  ;;  %v2422_v29 = vsel %vm1262_vm7, %v2406_v25, %v2134_v10 }
 0x42c   : > { %v2468_v46 = vsel %vm1325_vm10, %v2452_v49, %v2322_v14 }
 0x42d   : > { %3026 = vmatmul.mubr.msk.f32.gmra.mrb[12].mxu1 %vm1351_vm11, %v2468_v46 }
 0x42e   : > { %v2198_v52 = vpop.permute.xlu1 %2197 }
 0x42f   : > { %v2196_v18 = vpop.permute.xlu0 %2195  ;;  %v2438_v55 = vsel %vm1283_vm8, %v2422_v29, %v2198_v52 }
 0x430   : > { %v2437_v45 = vsel %vm1283_vm8, %v2421_v12, %v2196_v18 }
 0x432   : > { %v2262_v15 = vpop.permute.xlu1 %2261 }
 0x433   : > { %v2260_v61 = vpop.permute.xlu0 %2259  ;;  %v2454_v16 = vsel %vm1304_vm9, %v2438_v55, %v2262_v15 }
 0x434   : > { %v2453_v32 = vsel %vm1304_vm9, %v2437_v45, %v2260_v61 }
 0x436   : > { %v2326_v5 = vpop.permute.xlu1 %2325 }
 0x437   : > { %v2324_v11 = vpop.permute.xlu0 %2323  ;;  %v2470_v62 = vsel %vm1325_vm10, %v2454_v16, %v2326_v5 }
 0x438   : > { %v2469_v7 = vsel %vm1325_vm10, %v2453_v32, %v2324_v11 }
 0x439   : > { %3028 = vmatprep.mubr.msk.f32.mxu1 %vm1351_vm11, %v2469_v7 }
 0x43a   : > { %3029 = vmatmul.mubr.msk.f32.gmra.mrb[14].mxu1 %vm1351_vm11, %v2470_v62 }
 0x43f   : > { %v3009_v27 = vpop.f32.mrb[0].mxu1 }
 0x440   : > { %v2679_v35 = vmul.f32 %v3009_v27, %v4390_v40  ;;  %v2593_v1 = vpop.f32.mrb[1].mxu1 }
 0x441   : > { %v2678_v20 = vmul.f32 %v4390_v40, %v2593_v1 }
 0x442   : > { %v2695_v3 = vadd.f32 %v3838_v9, %v2679_v35 }
 0x443   : > { %v2694_v48 = vadd.f32 %v3838_v9, %v2678_v20 }
 0x444   : > { %v2711_v53 = vmax.f32 %v2695_v3, 0.0 }
 0x445   : > { %v2710_v31 = vmax.f32 %v2694_v48, 0.0 }
 0x446   : > { %2727 = vst.msk [vmem:[%s3273_s14 + $0x8] sm:$0xff] %vm276_vm1, %v2711_v53 }
 0x447   : > { %2726 = vst.msk [vmem:[%s3273_s14] sm:$0xff] %vm276_vm1, %v2710_v31 }
 0x45f   : > { %v3012_v56 = vpop.f32.mrb[2].mxu1 }
 0x460   : > { %v2681_v44 = vmul.f32 %v3012_v56, %v4390_v40  ;;  %v2603_v26 = vpop.f32.mrb[3].mxu1 }
 0x461   : > { %v2680_v4 = vmul.f32 %v4390_v40, %v2603_v26 }
 0x462   : > { %v2697_v42 = vadd.f32 %v3838_v9, %v2681_v44 }
 0x463   : > { %v2696_v19 = vadd.f32 %v3838_v9, %v2680_v4 }
 0x464   : > { %v2713_v33 = vmax.f32 %v2697_v42, 0.0 }
 0x465   : > { %v2712_v28 = vmax.f32 %v2696_v19, 0.0 }
 0x466   : > { %2729 = vst.msk [vmem:[%s3273_s14 + $0x18] sm:$0xff] %vm276_vm1, %v2713_v33 }
 0x467   : > { %2728 = vst.msk [vmem:[%s3273_s14 + $0x10] sm:$0xff] %vm276_vm1, %v2712_v28 }
 0x47f   : > { %v3015_v24 = vpop.f32.mrb[4].mxu1 }
 0x480   : > { %v2683_v17 = vmul.f32 %v3015_v24, %v4390_v40  ;;  %v2613_v51 = vpop.f32.mrb[5].mxu1 }
 0x481   : > { %v2682_v23 = vmul.f32 %v4390_v40, %v2613_v51 }
 0x482   : > { %v2699_v57 = vadd.f32 %v3838_v9, %v2683_v17 }
 0x483   : > { %v2698_v37 = vadd.f32 %v3838_v9, %v2682_v23 }
 0x484   : > { %v2715_v34 = vmax.f32 %v2699_v57, 0.0 }
 0x485   : > { %v2714_v22 = vmax.f32 %v2698_v37, 0.0 }
 0x486   : > { %2731 = vst.msk [vmem:[%s3273_s14 + $0x28] sm:$0xff] %vm276_vm1, %v2715_v34 }
 0x487   : > { %2730 = vst.msk [vmem:[%s3273_s14 + $0x20] sm:$0xff] %vm276_vm1, %v2714_v22 }
 0x49f   : > { %v3018_v36 = vpop.f32.mrb[6].mxu1 }
 0x4a0   : > { %v2685_v43 = vmul.f32 %v3018_v36, %v4390_v40  ;;  %v2623_v39 = vpop.f32.mrb[7].mxu1 }
 0x4a1   : > { %v2684_v59 = vmul.f32 %v4390_v40, %v2623_v39 }
 0x4a2   : > { %v2701_v13 = vadd.f32 %v3838_v9, %v2685_v43 }
 0x4a3   : > { %v2700_v58 = vadd.f32 %v3838_v9, %v2684_v59 }
 0x4a4   : > { %v2717_v38 = vmax.f32 %v2701_v13, 0.0 }
 0x4a5   : > { %v2716_v41 = vmax.f32 %v2700_v58, 0.0 }
 0x4a6   : > { %2733 = vst.msk [vmem:[%s3273_s14 + $0x38] sm:$0xff] %vm276_vm1, %v2717_v38 }
 0x4a7   : > { %2732 = vst.msk [vmem:[%s3273_s14 + $0x30] sm:$0xff] %vm276_vm1, %v2716_v41 }
 0x4bf   : > { %v3021_v47 = vpop.f32.mrb[8].mxu1 }
 0x4c0   : > { %v2687_v2 = vmul.f32 %v3021_v47, %v4390_v40  ;;  %v2633_v50 = vpop.f32.mrb[9].mxu1 }
 0x4c1   : > { %v2686_v8 = vmul.f32 %v4390_v40, %v2633_v50 }
 0x4c2   : > { %v2703_v49 = vadd.f32 %v3838_v9, %v2687_v2 }
 0x4c3   : > { %v2702_v10 = vadd.f32 %v3838_v9, %v2686_v8 }
 0x4c4   : > { %v2719_v14 = vmax.f32 %v2703_v49, 0.0 }
 0x4c5   : > { %v2718_v46 = vmax.f32 %v2702_v10, 0.0 }
 0x4c6   : > { %2735 = vst.msk [vmem:[%s3273_s14 + $0x48] sm:$0xff] %vm276_vm1, %v2719_v14 }
 0x4c7   : > { %2734 = vst.msk [vmem:[%s3273_s14 + $0x40] sm:$0xff] %vm276_vm1, %v2718_v46 }
 0x4df   : > { %v3024_v52 = vpop.f32.mrb[10].mxu1 }
 0x4e0   : > { %v2689_v18 = vmul.f32 %v3024_v52, %v4390_v40  ;;  %v2643_v21 = vpop.f32.mrb[11].mxu1 }
 0x4e1   : > { %v2688_v30 = vmul.f32 %v4390_v40, %v2643_v21 }
 0x4e2   : > { %v2705_v63 = vadd.f32 %v3838_v9, %v2689_v18 }
 0x4e3   : > { %v2704_v54 = vadd.f32 %v3838_v9, %v2688_v30 }
 0x4e4   : > { %v2721_v6 = vmax.f32 %v2705_v63, 0.0 }
 0x4e5   : > { %v2720_v0 = vmax.f32 %v2704_v54, 0.0 }
 0x4e6   : > { %2737 = vst.msk [vmem:[%s3273_s14 + $0x58] sm:$0xff] %vm276_vm1, %v2721_v6 }
 0x4e7   : > { %2736 = vst.msk [vmem:[%s3273_s14 + $0x50] sm:$0xff] %vm276_vm1, %v2720_v0 }
 0x500   : > { %v3027_v15 = vpop.f32.mrb[12].mxu1 }
 0x501   : > { %v2691_v61 = vmul.f32 %v3027_v15, %v4390_v40  ;;  %v2653_v60 = vpop.f32.mrb[13].mxu1 }
 0x502   : > { %v2690_v25 = vmul.f32 %v4390_v40, %v2653_v60 }
 0x503   : > { %v2707_v12 = vadd.f32 %v3838_v9, %v2691_v61 }
 0x504   : > { %v2706_v29 = vadd.f32 %v3838_v9, %v2690_v25 }
 0x505   : > { %v2723_v55 = vmax.f32 %v2707_v12, 0.0 }
 0x506   : > { %v2722_v45 = vmax.f32 %v2706_v29, 0.0 }
 0x507   : > { %2739 = vst.msk [vmem:[%s3273_s14 + $0x68] sm:$0xff] %vm276_vm1, %v2723_v55 }
 0x508   : > { %2738 = vst.msk [vmem:[%s3273_s14 + $0x60] sm:$0xff] %vm276_vm1, %v2722_v45 }
 0x50d   : > { %v3030_v16 = vpop.f32.mrb[14].mxu1 }
 0x50e   : > { %v2693_v32 = vmul.f32 %v3030_v16, %v4390_v40  ;;  %v2663_v5 = vpop.f32.mrb[15].mxu1 }
 0x50f   : > { %v2692_v11 = vmul.f32 %v4390_v40, %v2663_v5 }
 0x510   : > { %v2709_v62 = vadd.f32 %v3838_v9, %v2693_v32 }
 0x511   : > { %v2708_v7 = vadd.f32 %v3838_v9, %v2692_v11 }
 0x512   : > { %v2725_v27 = vmax.f32 %v2709_v62, 0.0 }
 0x513   : > { %v2724_v35 = vmax.f32 %v2708_v7, 0.0 }
 0x514   : > { %2741 = vst.msk [vmem:[%s3273_s14 + $0x78] sm:$0xff] %vm276_vm1, %v2725_v27 }
 0x515   : > { %2740 = vst.msk [vmem:[%s3273_s14 + $0x70] sm:$0xff] %vm276_vm1, %v2724_v35 }
 0x516 PF: > { %s15_s22 = sadd.s32 1, %s3136_s22   ;;  %s4477_s18 = smov %s3128_s20 }
 0x517   : > { %p12_p11 = scmp.ge.s32.totalorder %s15_s22, 6   ;;  %s4478_s19 = smov %s3132_s21 }
 0x518   : > { %s4479_s20 = smov %s4482_s23  ;;  %s4480_s21 = smov %s4486_s24 }
 0x519   :  { %14 = sbr.rel (!%p12_p11) target bundleno = 3 (0x3), region = 93 }

</bundles_post_ra>
